<compile_context>
chip_gen: v6e
topology: v6e:2x2x1
jax: 0.10.0
libtpu: 0.0.40
codegen_flags: <defaults>
</compile_context>

<pallas_src>
import jax
import jax.numpy as jnp
from jax.experimental import pallas as pl
from jax.experimental.pallas import tpu as pltpu


# -----------------------------------------------------------------------------
# Fused kernel: one grid step == one batch element
# -----------------------------------------------------------------------------
def fused_forward_kernel(xp_ref,                       # (1, L+2, Cin)  zero-padded input
                         w1_ref, b1_ref,               # (3, Cin, C1), (1, C1)  BN folded
                         w2_ref, b2_ref,               # (3, C1, C2),  (1, C2)  BN folded
                         wih_ref, bx_ref,              # (C2, 8H), (1, 8H)  both dirs, gates (i,f,o,g)
                         whh_f_ref, whh_b_ref,         # (H, 4H) each
                         watt_ref, batt_ref,           # (2H, 1), (1, 1)
                         wfc_ref, bfc_ref,             # (2H, C), (1, C)
                         o_ref,                        # (1, 1, C)
                         c1_ref, h1p_ref, c2_ref,      # VMEM scratch (conv activations)
                         zx_ref, fwd_ref, bwd_ref):    # VMEM scratch (LSTM)
    L = xp_ref.shape[1] - 2
    L1 = L // 2
    H = whh_f_ref.shape[0]
    T = zx_ref.shape[0]
    C1 = w1_ref.shape[2]

    # ---- Conv1d(k=3, pad=1) + folded BatchNorm + ReLU + MaxPool1d(2) ----------
    def conv_bn_relu_pool(read_tap, Lc, taps_ref, bias_ref, pre_ref):
        # read_tap(k) -> (Lc, Ci): rows k .. k+Lc-1 of the zero-padded input.
        Co = taps_ref.shape[2]
        acc = jnp.zeros((Lc, Co), jnp.float32)
        for k in range(3):                                   # 3 taps -> 3 MXU matmuls
            acc = acc + jnp.dot(read_tap(k), taps_ref[k],
                                preferred_element_type=jnp.float32)
        pre_ref[...] = jnp.maximum(acc + bias_ref[...], 0.0)  # conv bias + BN + ReLU
        Lo = Lc // 2
        # MaxPool1d(2): two strided reads + one wide max, no per-row loop/stores.
        return jnp.maximum(pre_ref[pl.ds(0, Lo, stride=2), :],
                           pre_ref[pl.ds(1, Lo, stride=2), :])

    # conv block 1 reads the (already zero-padded) input block directly
    h1 = conv_bn_relu_pool(lambda k: xp_ref[0, k:k + L, :], L,
                           w1_ref, b1_ref, c1_ref)            # (L/2, 32)

    # stage h1 into a zero-padded scratch so conv2 needs no in-kernel concat/pad
    h1p_ref[0:1, :] = jnp.zeros((1, C1), jnp.float32)
    h1p_ref[L1 + 1:L1 + 2, :] = jnp.zeros((1, C1), jnp.float32)
    h1p_ref[1:L1 + 1, :] = h1
    h2 = conv_bn_relu_pool(lambda k: h1p_ref[k:k + L1, :], L1,
                           w2_ref, b2_ref, c2_ref)            # (T, 64)

    # ---- LSTM input projection hoisted out of the recurrence ------------------
    # One (T, 64) x (64, 8H) matmul covers every timestep of both directions.
    zx_ref[...] = jnp.dot(h2, wih_ref[...],
                          preferred_element_type=jnp.float32) + bx_ref[...]

    # ---- bidirectional recurrence; gates packed (i, f, o, g) ------------------
    def run_direction(whh_ref, col_lo, hs_ref, reverse):
        whh = whh_ref[...]                                     # hoisted (H, 4H)
        h = jnp.zeros((1, H), jnp.float32)
        c = jnp.zeros((1, H), jnp.float32)
        # T = seq_len // 4 is small and static -> unrolled loop, all indices static.
        for s in range(T):
            t = T - 1 - s if reverse else s
            z = zx_ref[t:t + 1, col_lo:col_lo + 4 * H] + jnp.dot(
                h, whh, preferred_element_type=jnp.float32)    # (1, 4H)
            sg = jax.nn.sigmoid(z[:, 0:3 * H])                 # i, f, o in one slab
            g = jnp.tanh(z[:, 3 * H:4 * H])
            c = sg[:, H:2 * H] * c + sg[:, 0:H] * g            # c = f*c + i*g
            h = sg[:, 2 * H:3 * H] * jnp.tanh(c)               # h = o*tanh(c)
            hs_ref[t:t + 1, :] = h

    run_direction(whh_f_ref, 0, fwd_ref, reverse=False)
    run_direction(whh_b_ref, 4 * H, bwd_ref, reverse=True)

    # ---- attention over time + context + final FC -----------------------------
    # dropout(p=0.3) is identity in eval mode.
    # TODO(synk): training-mode dropout RNG not implemented (eval-mode only).
    fwd = fwd_ref[...]                                   # (T, H)
    bwd = bwd_ref[...]                                   # (T, H)
    watt = watt_ref[...]                                 # (2H, 1)
    logits = (jnp.dot(fwd, watt[0:H, :], preferred_element_type=jnp.float32)
              + jnp.dot(bwd, watt[H:2 * H, :], preferred_element_type=jnp.float32)
              + batt_ref[...])                           # (T, 1)
    m = jnp.max(logits, axis=0, keepdims=True)
    e = jnp.exp(logits - m)
    attn = e * pl.reciprocal(jnp.sum(e, axis=0, keepdims=True), approx=True)
    ctx_f = jnp.sum(attn * fwd, axis=0, keepdims=True)   # (1, H)
    ctx_b = jnp.sum(attn * bwd, axis=0, keepdims=True)   # (1, H)
    wfc = wfc_ref[...]                                   # (2H, C)
    out = (jnp.dot(ctx_f, wfc[0:H, :], preferred_element_type=jnp.float32)
           + jnp.dot(ctx_b, wfc[H:2 * H, :], preferred_element_type=jnp.float32)
           + bfc_ref[...])                               # (1, C)
    o_ref[0] = out.astype(o_ref.dtype)


# -----------------------------------------------------------------------------
# Wrapper: layout transposes, zero-padding, pallas_call plumbing
# -----------------------------------------------------------------------------
def respiratory_forward(x_ncl, p):
    """x_ncl: (B, input_dim, seq_len) float32, like the PyTorch module input."""
    x = jnp.transpose(x_ncl, (0, 2, 1)).astype(jnp.float32)   # NCL -> NLC
    B, L, Cin = x.shape
    assert L % 4 == 0, "seq_len must be divisible by 4 (two MaxPool(2) stages)"
    xp = jnp.pad(x, ((0, 0), (1, 1), (0, 0)))                 # conv1 zero padding

    C1 = p["w1"].shape[2]
    C2 = p["w2"].shape[2]
    H = p["whh_f"].shape[0]
    C = p["wfc"].shape[1]
    L1 = L // 2
    T = L1 // 2

    def full(a):
        # constant index_map -> weight block revisited every step, DMA'd once
        return pl.BlockSpec(a.shape, lambda b: (0,) * a.ndim)

    out = pl.pallas_call(
        fused_forward_kernel,
        out_shape=jax.ShapeDtypeStruct((B, 1, C), jnp.float32),
        grid=(B,),
        in_specs=[
            pl.BlockSpec((1, L + 2, Cin), lambda b: (b, 0, 0)),   # one batch / grid step
            full(p["w1"]), full(p["b1"]),
            full(p["w2"]), full(p["b2"]),
            full(p["wih"]), full(p["bx"]),
            full(p["whh_f"]), full(p["whh_b"]),
            full(p["watt"]), full(p["batt"]),
            full(p["wfc"]), full(p["bfc"]),
        ],
        out_specs=pl.BlockSpec((1, 1, C), lambda b: (b, 0, 0)),
        scratch_shapes=[
            pltpu.VMEM((L, C1), jnp.float32),        # conv1 pre-pool activations
            pltpu.VMEM((L1 + 2, C1), jnp.float32),   # zero-padded conv2 input
            pltpu.VMEM((L1, C2), jnp.float32),       # conv2 pre-pool activations
            pltpu.VMEM((T, 8 * H), jnp.float32),     # LSTM input projections (both dirs)
            pltpu.VMEM((T, H), jnp.float32),         # forward hidden states
            pltpu.VMEM((T, H), jnp.float32),         # backward hidden states
        ],
        compiler_params=pltpu.CompilerParams(
            dimension_semantics=("parallel",)),      # batch is parallel (megacore)
    )(xp, p["w1"], p["b1"], p["w2"], p["b2"], p["wih"], p["bx"],
      p["whh_f"], p["whh_b"], p["watt"], p["batt"], p["wfc"], p["bfc"])
    return out.reshape(B, C)


# -----------------------------------------------------------------------------
# Pure-JAX reference on the same packed parameters (for a correctness check)
# -----------------------------------------------------------------------------
def respiratory_forward_reference(x_ncl, p):
    x = jnp.transpose(x_ncl, (0, 2, 1)).astype(jnp.float32)
    H = p["whh_f"].shape[0]

    def conv_block(xin, taps, bias):
        B, Lc, _ = xin.shape
        xpad = jnp.pad(xin, ((0, 0), (1, 1), (0, 0)))
        acc = sum(jnp.einsum("blc,cd->bld", xpad[:, k:k + Lc, :], taps[k])
                  for k in range(3)) + bias
        acc = jnp.maximum(acc, 0.0)
        Lo = Lc // 2
        return jnp.maximum(acc[:, 0:2 * Lo:2, :], acc[:, 1:2 * Lo:2, :])

    h1 = conv_block(x, p["w1"], p["b1"])
    h2 = conv_block(h1, p["w2"], p["b2"])
    B, T, _ = h2.shape
    zx = jnp.einsum("btc,cg->btg", h2, p["wih"]) + p["bx"]

    def run_dir(whh, zslab, reverse):
        h = jnp.zeros((B, H), jnp.float32)
        c = jnp.zeros((B, H), jnp.float32)
        outs = [None] * T
        order = range(T - 1, -1, -1) if reverse else range(T)
        for t in order:
            z = zslab[:, t, :] + jnp.dot(h, whh)
            sg = jax.nn.sigmoid(z[:, 0:3 * H])
            g = jnp.tanh(z[:, 3 * H:4 * H])
            c = sg[:, H:2 * H] * c + sg[:, 0:H] * g
            h = sg[:, 2 * H:3 * H] * jnp.tanh(c)
            outs[t] = h
        return jnp.stack(outs, axis=1)

    fwd = run_dir(p["whh_f"], zx[:, :, 0:4 * H], False)
    bwd = run_dir(p["whh_b"], zx[:, :, 4 * H:8 * H], True)
    lstm_out = jnp.concatenate([fwd, bwd], axis=-1)
    logits = jnp.einsum("bth,ho->bto", lstm_out, p["watt"]) + p["batt"]
    attn = jax.nn.softmax(logits, axis=1)
    ctx = jnp.sum(attn * lstm_out, axis=1)
    return ctx @ p["wfc"] + p["bfc"]


# -----------------------------------------------------------------------------
# Deterministic parameter init (shapes mirror nn.Module.__init__), kernel layout
# -----------------------------------------------------------------------------
def init_params(key, input_dim=24, hidden_dim=64, num_classes=4):
    ks = jax.random.split(key, 32)
    ki = iter(ks)

    def rnd(shape, s=0.1):
        return (s * jax.random.normal(next(ki), shape)).astype(jnp.float32)

    eps = 1e-5
    H = hidden_dim
    D = 64   # LSTM input size == conv2 output channels

    def fold_conv_bn(cout, cin):
        # torch Conv1d weight (cout, cin, 3) + bias, BatchNorm1d eval statistics
        w = rnd((cout, cin, 3))
        b = rnd((cout,))
        gamma = 1.0 + rnd((cout,))
        beta = rnd((cout,))
        mean = rnd((cout,))
        var = jnp.abs(rnd((cout,))) + 1.0
        scale = gamma / jnp.sqrt(var + eps)
        shift = beta - mean * scale
        # y = (conv(x) + b)*scale + shift  ==  conv_{W*scale}(x) + (b*scale + shift)
        w_taps = jnp.transpose(w * scale[:, None, None], (2, 1, 0))   # (3, cin, cout)
        b_fold = (b * scale + shift).reshape(1, cout)
        return w_taps, b_fold

    p = {}
    p["w1"], p["b1"] = fold_conv_bn(32, input_dim)
    p["w2"], p["b2"] = fold_conv_bn(64, 32)

    # bidirectional LSTM: PyTorch gate row-order (i, f, g, o) repacked to (i, f, o, g)
    def reorder(a):                      # a: (4H, ...) with row blocks [i, f, g, o]
        return jnp.concatenate([a[0:H], a[H:2 * H], a[3 * H:4 * H], a[2 * H:3 * H]],
                               axis=0)

    wih_dirs, b_dirs, whh_dirs = [], [], []
    for _ in range(2):                   # forward, then reverse direction
        wih = rnd((4 * H, D))            # torch weight_ih
        whh = rnd((4 * H, H))            # torch weight_hh
        bih = rnd((4 * H,))
        bhh = rnd((4 * H,))
        wih_dirs.append(reorder(wih).T)                       # (D, 4H)
        whh_dirs.append(reorder(whh).T)                       # (H, 4H)
        b_dirs.append(reorder(bih + bhh).reshape(1, 4 * H))   # (1, 4H)
    p["wih"] = jnp.concatenate(wih_dirs, axis=1)              # (D, 8H)
    p["bx"] = jnp.concatenate(b_dirs, axis=1)                 # (1, 8H)
    p["whh_f"], p["whh_b"] = whh_dirs

    # attention Linear(2H, 1) and fc Linear(2H, num_classes)
    p["watt"] = rnd((1, 2 * H)).T                             # (2H, 1)
    p["batt"] = rnd((1, 1))
    p["wfc"] = rnd((num_classes, 2 * H)).T                    # (2H, C)
    p["bfc"] = rnd((1, num_classes))
    return p


if __name__ == "__main__":
    key = jax.random.PRNGKey(0)
    k_param, k_data = jax.random.split(key)

    batch, input_dim, seq_len = 2, 24, 16
    params = init_params(k_param, input_dim=input_dim, hidden_dim=64, num_classes=4)
    x = jax.random.normal(k_data, (batch, input_dim, seq_len), dtype=jnp.float32)

    fwd_fn = jax.jit(respiratory_forward)
    out = fwd_fn(x, params)
    jax.block_until_ready(out)

    assert out.shape == (batch, 4), out.shape
    assert bool(jnp.all(jnp.isfinite(out))), "non-finite output"

    with jax.default_matmul_precision("highest"):
        ref = respiratory_forward_reference(x, params)
    max_err = float(jnp.max(jnp.abs(out - ref)))
    assert max_err < 2e-3, f"mismatch vs reference: {max_err}"
    print("KERNEL_OK")
</pallas_src>

<mosaic_0001>
module attributes {stable_mosaic.version = 11 : i64} {
  func.func @fused_forward_kernel(%arg0: i32, %arg1: memref<1x18x24xf32, #tpu.memory_space<vmem>>, %arg2: memref<3x24x32xf32, #tpu.memory_space<vmem>>, %arg3: memref<1x32xf32, #tpu.memory_space<vmem>>, %arg4: memref<3x32x64xf32, #tpu.memory_space<vmem>>, %arg5: memref<1x64xf32, #tpu.memory_space<vmem>>, %arg6: memref<64x512xf32, #tpu.memory_space<vmem>>, %arg7: memref<1x512xf32, #tpu.memory_space<vmem>>, %arg8: memref<64x256xf32, #tpu.memory_space<vmem>>, %arg9: memref<64x256xf32, #tpu.memory_space<vmem>>, %arg10: memref<128x1xf32, #tpu.memory_space<vmem>>, %arg11: memref<1x1xf32, #tpu.memory_space<vmem>>, %arg12: memref<128x4xf32, #tpu.memory_space<vmem>>, %arg13: memref<1x4xf32, #tpu.memory_space<vmem>>, %arg14: memref<1x1x4xf32, #tpu.memory_space<vmem>>, %arg15: memref<16x32xf32, #tpu.memory_space<vmem>>, %arg16: memref<10x32xf32, #tpu.memory_space<vmem>>, %arg17: memref<8x64xf32, #tpu.memory_space<vmem>>, %arg18: memref<4x512xf32, #tpu.memory_space<vmem>>, %arg19: memref<4x64xf32, #tpu.memory_space<vmem>>, %arg20: memref<4x64xf32, #tpu.memory_space<vmem>>) attributes {dimension_semantics = [#tpu.dimension_semantics<parallel>], iteration_bounds = array<i64: 2>, scalar_prefetch = 0 : i64, scratch_operands = 6 : i64, tpu.core_type = #tpu.core_type<tc>, window_params = [{transform_indices = @transform_0, window_bounds = array<i64: 1, 18, 24>}, {pipeline_mode = #tpu.pipeline_mode<synchronous>, transform_indices = @transform_1, window_bounds = array<i64: 3, 24, 32>}, {pipeline_mode = #tpu.pipeline_mode<synchronous>, transform_indices = @transform_2, window_bounds = array<i64: 1, 32>}, {pipeline_mode = #tpu.pipeline_mode<synchronous>, transform_indices = @transform_3, window_bounds = array<i64: 3, 32, 64>}, {pipeline_mode = #tpu.pipeline_mode<synchronous>, transform_indices = @transform_4, window_bounds = array<i64: 1, 64>}, {pipeline_mode = #tpu.pipeline_mode<synchronous>, transform_indices = @transform_5, window_bounds = array<i64: 64, 512>}, {pipeline_mode = #tpu.pipeline_mode<synchronous>, transform_indices = @transform_6, window_bounds = array<i64: 1, 512>}, {pipeline_mode = #tpu.pipeline_mode<synchronous>, transform_indices = @transform_7, window_bounds = array<i64: 64, 256>}, {pipeline_mode = #tpu.pipeline_mode<synchronous>, transform_indices = @transform_8, window_bounds = array<i64: 64, 256>}, {pipeline_mode = #tpu.pipeline_mode<synchronous>, transform_indices = @transform_9, window_bounds = array<i64: 128, 1>}, {pipeline_mode = #tpu.pipeline_mode<synchronous>, transform_indices = @transform_10, window_bounds = array<i64: 1, 1>}, {pipeline_mode = #tpu.pipeline_mode<synchronous>, transform_indices = @transform_11, window_bounds = array<i64: 128, 4>}, {pipeline_mode = #tpu.pipeline_mode<synchronous>, transform_indices = @transform_12, window_bounds = array<i64: 1, 4>}, {transform_indices = @transform_13, window_bounds = array<i64: 1, 1, 4>}]} {
    %cst = arith.constant 0.000000e+00 : f32
    %0 = vector.broadcast %cst : f32 to vector<16x32xf32>
    %c0 = arith.constant 0 : index
    %c0_0 = arith.constant 0 : index
    %c0_1 = arith.constant 0 : index
    %1 = vector.load %arg1[%c0, %c0_0, %c0_1] : memref<1x18x24xf32, #tpu.memory_space<vmem>>, vector<1x16x24xf32>
    %2 = vector.shape_cast %1 : vector<1x16x24xf32> to vector<16x24xf32>
    %c0_2 = arith.constant 0 : index
    %c0_3 = arith.constant 0 : index
    %c0_4 = arith.constant 0 : index
    %3 = vector.load %arg2[%c0_2, %c0_3, %c0_4] : memref<3x24x32xf32, #tpu.memory_space<vmem>>, vector<1x24x32xf32>
    %4 = vector.shape_cast %3 : vector<1x24x32xf32> to vector<24x32xf32>
    %cst_5 = arith.constant dense<0.000000e+00> : vector<16x32xf32>
    %5 = tpu.matmul %2, %4, %cst_5 {dimension_numbers = #tpu.dot_dimension_numbers<[1], [0], [0], [1], [0, 0, 1, 1], [], []>} : vector<16x24xf32>, vector<24x32xf32>, vector<16x32xf32> -> vector<16x32xf32>
    %6 = arith.addf %0, %5 : vector<16x32xf32>
    %c0_6 = arith.constant 0 : index
    %c1 = arith.constant 1 : index
    %c0_7 = arith.constant 0 : index
    %7 = vector.load %arg1[%c0_6, %c1, %c0_7] : memref<1x18x24xf32, #tpu.memory_space<vmem>>, vector<1x16x24xf32>
    %8 = vector.shape_cast %7 : vector<1x16x24xf32> to vector<16x24xf32>
    %c1_8 = arith.constant 1 : index
    %c0_9 = arith.constant 0 : index
    %c0_10 = arith.constant 0 : index
    %9 = vector.load %arg2[%c1_8, %c0_9, %c0_10] : memref<3x24x32xf32, #tpu.memory_space<vmem>>, vector<1x24x32xf32>
    %10 = vector.shape_cast %9 : vector<1x24x32xf32> to vector<24x32xf32>
    %cst_11 = arith.constant dense<0.000000e+00> : vector<16x32xf32>
    %11 = tpu.matmul %8, %10, %cst_11 {dimension_numbers = #tpu.dot_dimension_numbers<[1], [0], [0], [1], [0, 0, 1, 1], [], []>} : vector<16x24xf32>, vector<24x32xf32>, vector<16x32xf32> -> vector<16x32xf32>
    %12 = arith.addf %6, %11 : vector<16x32xf32>
    %c0_12 = arith.constant 0 : index
    %c2 = arith.constant 2 : index
    %c0_13 = arith.constant 0 : index
    %13 = vector.load %arg1[%c0_12, %c2, %c0_13] : memref<1x18x24xf32, #tpu.memory_space<vmem>>, vector<1x16x24xf32>
    %14 = vector.shape_cast %13 : vector<1x16x24xf32> to vector<16x24xf32>
    %c2_14 = arith.constant 2 : index
    %c0_15 = arith.constant 0 : index
    %c0_16 = arith.constant 0 : index
    %15 = vector.load %arg2[%c2_14, %c0_15, %c0_16] : memref<3x24x32xf32, #tpu.memory_space<vmem>>, vector<1x24x32xf32>
    %16 = vector.shape_cast %15 : vector<1x24x32xf32> to vector<24x32xf32>
    %cst_17 = arith.constant dense<0.000000e+00> : vector<16x32xf32>
    %17 = tpu.matmul %14, %16, %cst_17 {dimension_numbers = #tpu.dot_dimension_numbers<[1], [0], [0], [1], [0, 0, 1, 1], [], []>} : vector<16x24xf32>, vector<24x32xf32>, vector<16x32xf32> -> vector<16x32xf32>
    %18 = arith.addf %12, %17 : vector<16x32xf32>
    %c0_18 = arith.constant 0 : index
    %c0_19 = arith.constant 0 : index
    %19 = vector.load %arg3[%c0_18, %c0_19] : memref<1x32xf32, #tpu.memory_space<vmem>>, vector<1x32xf32>
    %20 = vector.broadcast %19 : vector<1x32xf32> to vector<16x32xf32>
    %21 = arith.addf %18, %20 : vector<16x32xf32>
    %cst_20 = arith.constant 0.000000e+00 : f32
    %22 = vector.broadcast %cst_20 : f32 to vector<16x32xf32>
    %23 = arith.maximumf %21, %22 : vector<16x32xf32>
    %c0_21 = arith.constant 0 : index
    %c0_22 = arith.constant 0 : index
    %24 = vector.load %arg15[%c0_21, %c0_22] : memref<16x32xf32, #tpu.memory_space<vmem>>, vector<16x32xf32>
    tpu.vector_store %arg15[%c0_21, %c0_22], %23 {strides = array<i32>} : memref<16x32xf32, #tpu.memory_space<vmem>>, vector<16x32xf32>,
    %c0_23 = arith.constant 0 : index
    %c0_24 = arith.constant 0 : index
    %25 = tpu.strided_load %arg15[%c0_23, %c0_24] {strides = array<i32: 2, 1>} : memref<16x32xf32, #tpu.memory_space<vmem>>, vector<8x32xf32>
    %c1_25 = arith.constant 1 : index
    %c0_26 = arith.constant 0 : index
    %26 = tpu.strided_load %arg15[%c1_25, %c0_26] {strides = array<i32: 2, 1>} : memref<16x32xf32, #tpu.memory_space<vmem>>, vector<8x32xf32>
    %27 = arith.maximumf %25, %26 : vector<8x32xf32>
    %cst_27 = arith.constant 0.000000e+00 : f32
    %28 = vector.broadcast %cst_27 : f32 to vector<1x32xf32>
    %c0_28 = arith.constant 0 : index
    %c0_29 = arith.constant 0 : index
    %29 = vector.load %arg16[%c0_28, %c0_29] : memref<10x32xf32, #tpu.memory_space<vmem>>, vector<1x32xf32>
    tpu.vector_store %arg16[%c0_28, %c0_29], %28 {strides = array<i32>} : memref<10x32xf32, #tpu.memory_space<vmem>>, vector<1x32xf32>,
    %cst_30 = arith.constant 0.000000e+00 : f32
    %30 = vector.broadcast %cst_30 : f32 to vector<1x32xf32>
    %c9 = arith.constant 9 : index
    %c0_31 = arith.constant 0 : index
    %31 = vector.load %arg16[%c9, %c0_31] : memref<10x32xf32, #tpu.memory_space<vmem>>, vector<1x32xf32>
    tpu.vector_store %arg16[%c9, %c0_31], %30 {strides = array<i32>} : memref<10x32xf32, #tpu.memory_space<vmem>>, vector<1x32xf32>,
    %c1_32 = arith.constant 1 : index
    %c0_33 = arith.constant 0 : index
    %32 = vector.load %arg16[%c1_32, %c0_33] : memref<10x32xf32, #tpu.memory_space<vmem>>, vector<8x32xf32>
    tpu.vector_store %arg16[%c1_32, %c0_33], %27 {strides = array<i32>} : memref<10x32xf32, #tpu.memory_space<vmem>>, vector<8x32xf32>,
    %cst_34 = arith.constant 0.000000e+00 : f32
    %33 = vector.broadcast %cst_34 : f32 to vector<8x64xf32>
    %c0_35 = arith.constant 0 : index
    %c0_36 = arith.constant 0 : index
    %34 = vector.load %arg16[%c0_35, %c0_36] : memref<10x32xf32, #tpu.memory_space<vmem>>, vector<8x32xf32>
    %c0_37 = arith.constant 0 : index
    %c0_38 = arith.constant 0 : index
    %c0_39 = arith.constant 0 : index
    %35 = vector.load %arg4[%c0_37, %c0_38, %c0_39] : memref<3x32x64xf32, #tpu.memory_space<vmem>>, vector<1x32x64xf32>
    %36 = vector.shape_cast %35 : vector<1x32x64xf32> to vector<32x64xf32>
    %cst_40 = arith.constant dense<0.000000e+00> : vector<8x64xf32>
    %37 = tpu.matmul %34, %36, %cst_40 {dimension_numbers = #tpu.dot_dimension_numbers<[1], [0], [0], [1], [0, 0, 1, 1], [], []>} : vector<8x32xf32>, vector<32x64xf32>, vector<8x64xf32> -> vector<8x64xf32>
    %38 = arith.addf %33, %37 : vector<8x64xf32>
    %c1_41 = arith.constant 1 : index
    %c0_42 = arith.constant 0 : index
    %39 = vector.load %arg16[%c1_41, %c0_42] : memref<10x32xf32, #tpu.memory_space<vmem>>, vector<8x32xf32>
    %c1_43 = arith.constant 1 : index
    %c0_44 = arith.constant 0 : index
    %c0_45 = arith.constant 0 : index
    %40 = vector.load %arg4[%c1_43, %c0_44, %c0_45] : memref<3x32x64xf32, #tpu.memory_space<vmem>>, vector<1x32x64xf32>
    %41 = vector.shape_cast %40 : vector<1x32x64xf32> to vector<32x64xf32>
    %cst_46 = arith.constant dense<0.000000e+00> : vector<8x64xf32>
    %42 = tpu.matmul %39, %41, %cst_46 {dimension_numbers = #tpu.dot_dimension_numbers<[1], [0], [0], [1], [0, 0, 1, 1], [], []>} : vector<8x32xf32>, vector<32x64xf32>, vector<8x64xf32> -> vector<8x64xf32>
    %43 = arith.addf %38, %42 : vector<8x64xf32>
    %c2_47 = arith.constant 2 : index
    %c0_48 = arith.constant 0 : index
    %44 = vector.load %arg16[%c2_47, %c0_48] : memref<10x32xf32, #tpu.memory_space<vmem>>, vector<8x32xf32>
    %c2_49 = arith.constant 2 : index
    %c0_50 = arith.constant 0 : index
    %c0_51 = arith.constant 0 : index
    %45 = vector.load %arg4[%c2_49, %c0_50, %c0_51] : memref<3x32x64xf32, #tpu.memory_space<vmem>>, vector<1x32x64xf32>
    %46 = vector.shape_cast %45 : vector<1x32x64xf32> to vector<32x64xf32>
    %cst_52 = arith.constant dense<0.000000e+00> : vector<8x64xf32>
    %47 = tpu.matmul %44, %46, %cst_52 {dimension_numbers = #tpu.dot_dimension_numbers<[1], [0], [0], [1], [0, 0, 1, 1], [], []>} : vector<8x32xf32>, vector<32x64xf32>, vector<8x64xf32> -> vector<8x64xf32>
    %48 = arith.addf %43, %47 : vector<8x64xf32>
    %c0_53 = arith.constant 0 : index
    %c0_54 = arith.constant 0 : index
    %49 = vector.load %arg5[%c0_53, %c0_54] : memref<1x64xf32, #tpu.memory_space<vmem>>, vector<1x64xf32>
    %50 = vector.broadcast %49 : vector<1x64xf32> to vector<8x64xf32>
    %51 = arith.addf %48, %50 : vector<8x64xf32>
    %cst_55 = arith.constant 0.000000e+00 : f32
    %52 = vector.broadcast %cst_55 : f32 to vector<8x64xf32>
    %53 = arith.maximumf %51, %52 : vector<8x64xf32>
    %c0_56 = arith.constant 0 : index
    %c0_57 = arith.constant 0 : index
    %54 = vector.load %arg17[%c0_56, %c0_57] : memref<8x64xf32, #tpu.memory_space<vmem>>, vector<8x64xf32>
    tpu.vector_store %arg17[%c0_56, %c0_57], %53 {strides = array<i32>} : memref<8x64xf32, #tpu.memory_space<vmem>>, vector<8x64xf32>,
    %c0_58 = arith.constant 0 : index
    %c0_59 = arith.constant 0 : index
    %55 = tpu.strided_load %arg17[%c0_58, %c0_59] {strides = array<i32: 2, 1>} : memref<8x64xf32, #tpu.memory_space<vmem>>, vector<4x64xf32>
    %c1_60 = arith.constant 1 : index
    %c0_61 = arith.constant 0 : index
    %56 = tpu.strided_load %arg17[%c1_60, %c0_61] {strides = array<i32: 2, 1>} : memref<8x64xf32, #tpu.memory_space<vmem>>, vector<4x64xf32>
    %57 = arith.maximumf %55, %56 : vector<4x64xf32>
    %c0_62 = arith.constant 0 : index
    %c0_63 = arith.constant 0 : index
    %58 = vector.load %arg6[%c0_62, %c0_63] : memref<64x512xf32, #tpu.memory_space<vmem>>, vector<64x512xf32>
    %cst_64 = arith.constant dense<0.000000e+00> : vector<4x512xf32>
    %59 = tpu.matmul %57, %58, %cst_64 {dimension_numbers = #tpu.dot_dimension_numbers<[1], [0], [0], [1], [0, 0, 1, 1], [], []>} : vector<4x64xf32>, vector<64x512xf32>, vector<4x512xf32> -> vector<4x512xf32>
    %c0_65 = arith.constant 0 : index
    %c0_66 = arith.constant 0 : index
    %60 = vector.load %arg7[%c0_65, %c0_66] : memref<1x512xf32, #tpu.memory_space<vmem>>, vector<1x512xf32>
    %61 = vector.broadcast %60 : vector<1x512xf32> to vector<4x512xf32>
    %62 = arith.addf %59, %61 : vector<4x512xf32>
    %c0_67 = arith.constant 0 : index
    %c0_68 = arith.constant 0 : index
    %63 = vector.load %arg18[%c0_67, %c0_68] : memref<4x512xf32, #tpu.memory_space<vmem>>, vector<4x512xf32>
    tpu.vector_store %arg18[%c0_67, %c0_68], %62 {strides = array<i32>} : memref<4x512xf32, #tpu.memory_space<vmem>>, vector<4x512xf32>,
    %c0_69 = arith.constant 0 : index
    %c0_70 = arith.constant 0 : index
    %64 = vector.load %arg8[%c0_69, %c0_70] : memref<64x256xf32, #tpu.memory_space<vmem>>, vector<64x256xf32>
    %cst_71 = arith.constant 0.000000e+00 : f32
    %65 = vector.broadcast %cst_71 : f32 to vector<1x64xf32>
    %cst_72 = arith.constant 0.000000e+00 : f32
    %66 = vector.broadcast %cst_72 : f32 to vector<1x64xf32>
    %c0_73 = arith.constant 0 : index
    %c0_74 = arith.constant 0 : index
    %67 = vector.load %arg18[%c0_73, %c0_74] : memref<4x512xf32, #tpu.memory_space<vmem>>, vector<1x256xf32>
    %cst_75 = arith.constant dense<0.000000e+00> : vector<1x256xf32>
    %68 = tpu.matmul %65, %64, %cst_75 {dimension_numbers = #tpu.dot_dimension_numbers<[1], [0], [0], [1], [0, 0, 1, 1], [], []>} : vector<1x64xf32>, vector<64x256xf32>, vector<1x256xf32> -> vector<1x256xf32>
    %69 = arith.addf %67, %68 : vector<1x256xf32>
    %70 = vector.extract_strided_slice %69 {offsets = [0, 0], sizes = [1, 192], strides = [1, 1]} : vector<1x256xf32> to vector<1x192xf32>
    %71 = arith.negf %70 : vector<1x192xf32>
    %72 = math.exp %71 : vector<1x192xf32>
    %cst_76 = arith.constant 1.000000e+00 : f32
    %73 = vector.broadcast %cst_76 : f32 to vector<1x192xf32>
    %74 = arith.addf %73, %72 : vector<1x192xf32>
    %75 = arith.divf %73, %74 : vector<1x192xf32>
    %76 = vector.extract_strided_slice %69 {offsets = [0, 192], sizes = [1, 64], strides = [1, 1]} : vector<1x256xf32> to vector<1x64xf32>
    %77 = math.tanh %76 : vector<1x64xf32>
    %78 = vector.extract_strided_slice %75 {offsets = [0, 64], sizes = [1, 64], strides = [1, 1]} : vector<1x192xf32> to vector<1x64xf32>
    %79 = arith.mulf %78, %66 : vector<1x64xf32>
    %80 = vector.extract_strided_slice %75 {offsets = [0, 0], sizes = [1, 64], strides = [1, 1]} : vector<1x192xf32> to vector<1x64xf32>
    %81 = arith.mulf %80, %77 : vector<1x64xf32>
    %82 = arith.addf %79, %81 : vector<1x64xf32>
    %83 = vector.extract_strided_slice %75 {offsets = [0, 128], sizes = [1, 64], strides = [1, 1]} : vector<1x192xf32> to vector<1x64xf32>
    %84 = math.tanh %82 : vector<1x64xf32>
    %85 = arith.mulf %83, %84 : vector<1x64xf32>
    %c0_77 = arith.constant 0 : index
    %c0_78 = arith.constant 0 : index
    %86 = vector.load %arg19[%c0_77, %c0_78] : memref<4x64xf32, #tpu.memory_space<vmem>>, vector<1x64xf32>
    tpu.vector_store %arg19[%c0_77, %c0_78], %85 {strides = array<i32>} : memref<4x64xf32, #tpu.memory_space<vmem>>, vector<1x64xf32>,
    %c1_79 = arith.constant 1 : index
    %c0_80 = arith.constant 0 : index
    %87 = vector.load %arg18[%c1_79, %c0_80] : memref<4x512xf32, #tpu.memory_space<vmem>>, vector<1x256xf32>
    %cst_81 = arith.constant dense<0.000000e+00> : vector<1x256xf32>
    %88 = tpu.matmul %85, %64, %cst_81 {dimension_numbers = #tpu.dot_dimension_numbers<[1], [0], [0], [1], [0, 0, 1, 1], [], []>} : vector<1x64xf32>, vector<64x256xf32>, vector<1x256xf32> -> vector<1x256xf32>
    %89 = arith.addf %87, %88 : vector<1x256xf32>
    %90 = vector.extract_strided_slice %89 {offsets = [0, 0], sizes = [1, 192], strides = [1, 1]} : vector<1x256xf32> to vector<1x192xf32>
    %91 = arith.negf %90 : vector<1x192xf32>
    %92 = math.exp %91 : vector<1x192xf32>
    %cst_82 = arith.constant 1.000000e+00 : f32
    %93 = vector.broadcast %cst_82 : f32 to vector<1x192xf32>
    %94 = arith.addf %93, %92 : vector<1x192xf32>
    %95 = arith.divf %93, %94 : vector<1x192xf32>
    %96 = vector.extract_strided_slice %89 {offsets = [0, 192], sizes = [1, 64], strides = [1, 1]} : vector<1x256xf32> to vector<1x64xf32>
    %97 = math.tanh %96 : vector<1x64xf32>
    %98 = vector.extract_strided_slice %95 {offsets = [0, 64], sizes = [1, 64], strides = [1, 1]} : vector<1x192xf32> to vector<1x64xf32>
    %99 = arith.mulf %98, %82 : vector<1x64xf32>
    %100 = vector.extract_strided_slice %95 {offsets = [0, 0], sizes = [1, 64], strides = [1, 1]} : vector<1x192xf32> to vector<1x64xf32>
    %101 = arith.mulf %100, %97 : vector<1x64xf32>
    %102 = arith.addf %99, %101 : vector<1x64xf32>
    %103 = vector.extract_strided_slice %95 {offsets = [0, 128], sizes = [1, 64], strides = [1, 1]} : vector<1x192xf32> to vector<1x64xf32>
    %104 = math.tanh %102 : vector<1x64xf32>
    %105 = arith.mulf %103, %104 : vector<1x64xf32>
    %c1_83 = arith.constant 1 : index
    %c0_84 = arith.constant 0 : index
    %106 = vector.load %arg19[%c1_83, %c0_84] : memref<4x64xf32, #tpu.memory_space<vmem>>, vector<1x64xf32>
    tpu.vector_store %arg19[%c1_83, %c0_84], %105 {strides = array<i32>} : memref<4x64xf32, #tpu.memory_space<vmem>>, vector<1x64xf32>,
    %c2_85 = arith.constant 2 : index
    %c0_86 = arith.constant 0 : index
    %107 = vector.load %arg18[%c2_85, %c0_86] : memref<4x512xf32, #tpu.memory_space<vmem>>, vector<1x256xf32>
    %cst_87 = arith.constant dense<0.000000e+00> : vector<1x256xf32>
    %108 = tpu.matmul %105, %64, %cst_87 {dimension_numbers = #tpu.dot_dimension_numbers<[1], [0], [0], [1], [0, 0, 1, 1], [], []>} : vector<1x64xf32>, vector<64x256xf32>, vector<1x256xf32> -> vector<1x256xf32>
    %109 = arith.addf %107, %108 : vector<1x256xf32>
    %110 = vector.extract_strided_slice %109 {offsets = [0, 0], sizes = [1, 192], strides = [1, 1]} : vector<1x256xf32> to vector<1x192xf32>
    %111 = arith.negf %110 : vector<1x192xf32>
    %112 = math.exp %111 : vector<1x192xf32>
    %cst_88 = arith.constant 1.000000e+00 : f32
    %113 = vector.broadcast %cst_88 : f32 to vector<1x192xf32>
    %114 = arith.addf %113, %112 : vector<1x192xf32>
    %115 = arith.divf %113, %114 : vector<1x192xf32>
    %116 = vector.extract_strided_slice %109 {offsets = [0, 192], sizes = [1, 64], strides = [1, 1]} : vector<1x256xf32> to vector<1x64xf32>
    %117 = math.tanh %116 : vector<1x64xf32>
    %118 = vector.extract_strided_slice %115 {offsets = [0, 64], sizes = [1, 64], strides = [1, 1]} : vector<1x192xf32> to vector<1x64xf32>
    %119 = arith.mulf %118, %102 : vector<1x64xf32>
    %120 = vector.extract_strided_slice %115 {offsets = [0, 0], sizes = [1, 64], strides = [1, 1]} : vector<1x192xf32> to vector<1x64xf32>
    %121 = arith.mulf %120, %117 : vector<1x64xf32>
    %122 = arith.addf %119, %121 : vector<1x64xf32>
    %123 = vector.extract_strided_slice %115 {offsets = [0, 128], sizes = [1, 64], strides = [1, 1]} : vector<1x192xf32> to vector<1x64xf32>
    %124 = math.tanh %122 : vector<1x64xf32>
    %125 = arith.mulf %123, %124 : vector<1x64xf32>
    %c2_89 = arith.constant 2 : index
    %c0_90 = arith.constant 0 : index
    %126 = vector.load %arg19[%c2_89, %c0_90] : memref<4x64xf32, #tpu.memory_space<vmem>>, vector<1x64xf32>
    tpu.vector_store %arg19[%c2_89, %c0_90], %125 {strides = array<i32>} : memref<4x64xf32, #tpu.memory_space<vmem>>, vector<1x64xf32>,
    %c3 = arith.constant 3 : index
    %c0_91 = arith.constant 0 : index
    %127 = vector.load %arg18[%c3, %c0_91] : memref<4x512xf32, #tpu.memory_space<vmem>>, vector<1x256xf32>
    %cst_92 = arith.constant dense<0.000000e+00> : vector<1x256xf32>
    %128 = tpu.matmul %125, %64, %cst_92 {dimension_numbers = #tpu.dot_dimension_numbers<[1], [0], [0], [1], [0, 0, 1, 1], [], []>} : vector<1x64xf32>, vector<64x256xf32>, vector<1x256xf32> -> vector<1x256xf32>
    %129 = arith.addf %127, %128 : vector<1x256xf32>
    %130 = vector.extract_strided_slice %129 {offsets = [0, 0], sizes = [1, 192], strides = [1, 1]} : vector<1x256xf32> to vector<1x192xf32>
    %131 = arith.negf %130 : vector<1x192xf32>
    %132 = math.exp %131 : vector<1x192xf32>
    %cst_93 = arith.constant 1.000000e+00 : f32
    %133 = vector.broadcast %cst_93 : f32 to vector<1x192xf32>
    %134 = arith.addf %133, %132 : vector<1x192xf32>
    %135 = arith.divf %133, %134 : vector<1x192xf32>
    %136 = vector.extract_strided_slice %129 {offsets = [0, 192], sizes = [1, 64], strides = [1, 1]} : vector<1x256xf32> to vector<1x64xf32>
    %137 = math.tanh %136 : vector<1x64xf32>
    %138 = vector.extract_strided_slice %135 {offsets = [0, 64], sizes = [1, 64], strides = [1, 1]} : vector<1x192xf32> to vector<1x64xf32>
    %139 = arith.mulf %138, %122 : vector<1x64xf32>
    %140 = vector.extract_strided_slice %135 {offsets = [0, 0], sizes = [1, 64], strides = [1, 1]} : vector<1x192xf32> to vector<1x64xf32>
    %141 = arith.mulf %140, %137 : vector<1x64xf32>
    %142 = arith.addf %139, %141 : vector<1x64xf32>
    %143 = vector.extract_strided_slice %135 {offsets = [0, 128], sizes = [1, 64], strides = [1, 1]} : vector<1x192xf32> to vector<1x64xf32>
    %144 = math.tanh %142 : vector<1x64xf32>
    %145 = arith.mulf %143, %144 : vector<1x64xf32>
    %c3_94 = arith.constant 3 : index
    %c0_95 = arith.constant 0 : index
    %146 = vector.load %arg19[%c3_94, %c0_95] : memref<4x64xf32, #tpu.memory_space<vmem>>, vector<1x64xf32>
    tpu.vector_store %arg19[%c3_94, %c0_95], %145 {strides = array<i32>} : memref<4x64xf32, #tpu.memory_space<vmem>>, vector<1x64xf32>,
    %c0_96 = arith.constant 0 : index
    %c0_97 = arith.constant 0 : index
    %147 = vector.load %arg9[%c0_96, %c0_97] : memref<64x256xf32, #tpu.memory_space<vmem>>, vector<64x256xf32>
    %cst_98 = arith.constant 0.000000e+00 : f32
    %148 = vector.broadcast %cst_98 : f32 to vector<1x64xf32>
    %cst_99 = arith.constant 0.000000e+00 : f32
    %149 = vector.broadcast %cst_99 : f32 to vector<1x64xf32>
    %c3_100 = arith.constant 3 : index
    %c256 = arith.constant 256 : index
    %150 = vector.load %arg18[%c3_100, %c256] : memref<4x512xf32, #tpu.memory_space<vmem>>, vector<1x256xf32>
    %cst_101 = arith.constant dense<0.000000e+00> : vector<1x256xf32>
    %151 = tpu.matmul %148, %147, %cst_101 {dimension_numbers = #tpu.dot_dimension_numbers<[1], [0], [0], [1], [0, 0, 1, 1], [], []>} : vector<1x64xf32>, vector<64x256xf32>, vector<1x256xf32> -> vector<1x256xf32>
    %152 = arith.addf %150, %151 : vector<1x256xf32>
    %153 = vector.extract_strided_slice %152 {offsets = [0, 0], sizes = [1, 192], strides = [1, 1]} : vector<1x256xf32> to vector<1x192xf32>
    %154 = arith.negf %153 : vector<1x192xf32>
    %155 = math.exp %154 : vector<1x192xf32>
    %cst_102 = arith.constant 1.000000e+00 : f32
    %156 = vector.broadcast %cst_102 : f32 to vector<1x192xf32>
    %157 = arith.addf %156, %155 : vector<1x192xf32>
    %158 = arith.divf %156, %157 : vector<1x192xf32>
    %159 = vector.extract_strided_slice %152 {offsets = [0, 192], sizes = [1, 64], strides = [1, 1]} : vector<1x256xf32> to vector<1x64xf32>
    %160 = math.tanh %159 : vector<1x64xf32>
    %161 = vector.extract_strided_slice %158 {offsets = [0, 64], sizes = [1, 64], strides = [1, 1]} : vector<1x192xf32> to vector<1x64xf32>
    %162 = arith.mulf %161, %149 : vector<1x64xf32>
    %163 = vector.extract_strided_slice %158 {offsets = [0, 0], sizes = [1, 64], strides = [1, 1]} : vector<1x192xf32> to vector<1x64xf32>
    %164 = arith.mulf %163, %160 : vector<1x64xf32>
    %165 = arith.addf %162, %164 : vector<1x64xf32>
    %166 = vector.extract_strided_slice %158 {offsets = [0, 128], sizes = [1, 64], strides = [1, 1]} : vector<1x192xf32> to vector<1x64xf32>
    %167 = math.tanh %165 : vector<1x64xf32>
    %168 = arith.mulf %166, %167 : vector<1x64xf32>
    %c3_103 = arith.constant 3 : index
    %c0_104 = arith.constant 0 : index
    %169 = vector.load %arg20[%c3_103, %c0_104] : memref<4x64xf32, #tpu.memory_space<vmem>>, vector<1x64xf32>
    tpu.vector_store %arg20[%c3_103, %c0_104], %168 {strides = array<i32>} : memref<4x64xf32, #tpu.memory_space<vmem>>, vector<1x64xf32>,
    %c2_105 = arith.constant 2 : index
    %c256_106 = arith.constant 256 : index
    %170 = vector.load %arg18[%c2_105, %c256_106] : memref<4x512xf32, #tpu.memory_space<vmem>>, vector<1x256xf32>
    %cst_107 = arith.constant dense<0.000000e+00> : vector<1x256xf32>
    %171 = tpu.matmul %168, %147, %cst_107 {dimension_numbers = #tpu.dot_dimension_numbers<[1], [0], [0], [1], [0, 0, 1, 1], [], []>} : vector<1x64xf32>, vector<64x256xf32>, vector<1x256xf32> -> vector<1x256xf32>
    %172 = arith.addf %170, %171 : vector<1x256xf32>
    %173 = vector.extract_strided_slice %172 {offsets = [0, 0], sizes = [1, 192], strides = [1, 1]} : vector<1x256xf32> to vector<1x192xf32>
    %174 = arith.negf %173 : vector<1x192xf32>
    %175 = math.exp %174 : vector<1x192xf32>
    %cst_108 = arith.constant 1.000000e+00 : f32
    %176 = vector.broadcast %cst_108 : f32 to vector<1x192xf32>
    %177 = arith.addf %176, %175 : vector<1x192xf32>
    %178 = arith.divf %176, %177 : vector<1x192xf32>
    %179 = vector.extract_strided_slice %172 {offsets = [0, 192], sizes = [1, 64], strides = [1, 1]} : vector<1x256xf32> to vector<1x64xf32>
    %180 = math.tanh %179 : vector<1x64xf32>
    %181 = vector.extract_strided_slice %178 {offsets = [0, 64], sizes = [1, 64], strides = [1, 1]} : vector<1x192xf32> to vector<1x64xf32>
    %182 = arith.mulf %181, %165 : vector<1x64xf32>
    %183 = vector.extract_strided_slice %178 {offsets = [0, 0], sizes = [1, 64], strides = [1, 1]} : vector<1x192xf32> to vector<1x64xf32>
    %184 = arith.mulf %183, %180 : vector<1x64xf32>
    %185 = arith.addf %182, %184 : vector<1x64xf32>
    %186 = vector.extract_strided_slice %178 {offsets = [0, 128], sizes = [1, 64], strides = [1, 1]} : vector<1x192xf32> to vector<1x64xf32>
    %187 = math.tanh %185 : vector<1x64xf32>
    %188 = arith.mulf %186, %187 : vector<1x64xf32>
    %c2_109 = arith.constant 2 : index
    %c0_110 = arith.constant 0 : index
    %189 = vector.load %arg20[%c2_109, %c0_110] : memref<4x64xf32, #tpu.memory_space<vmem>>, vector<1x64xf32>
    tpu.vector_store %arg20[%c2_109, %c0_110], %188 {strides = array<i32>} : memref<4x64xf32, #tpu.memory_space<vmem>>, vector<1x64xf32>,
    %c1_111 = arith.constant 1 : index
    %c256_112 = arith.constant 256 : index
    %190 = vector.load %arg18[%c1_111, %c256_112] : memref<4x512xf32, #tpu.memory_space<vmem>>, vector<1x256xf32>
    %cst_113 = arith.constant dense<0.000000e+00> : vector<1x256xf32>
    %191 = tpu.matmul %188, %147, %cst_113 {dimension_numbers = #tpu.dot_dimension_numbers<[1], [0], [0], [1], [0, 0, 1, 1], [], []>} : vector<1x64xf32>, vector<64x256xf32>, vector<1x256xf32> -> vector<1x256xf32>
    %192 = arith.addf %190, %191 : vector<1x256xf32>
    %193 = vector.extract_strided_slice %192 {offsets = [0, 0], sizes = [1, 192], strides = [1, 1]} : vector<1x256xf32> to vector<1x192xf32>
    %194 = arith.negf %193 : vector<1x192xf32>
    %195 = math.exp %194 : vector<1x192xf32>
    %cst_114 = arith.constant 1.000000e+00 : f32
    %196 = vector.broadcast %cst_114 : f32 to vector<1x192xf32>
    %197 = arith.addf %196, %195 : vector<1x192xf32>
    %198 = arith.divf %196, %197 : vector<1x192xf32>
    %199 = vector.extract_strided_slice %192 {offsets = [0, 192], sizes = [1, 64], strides = [1, 1]} : vector<1x256xf32> to vector<1x64xf32>
    %200 = math.tanh %199 : vector<1x64xf32>
    %201 = vector.extract_strided_slice %198 {offsets = [0, 64], sizes = [1, 64], strides = [1, 1]} : vector<1x192xf32> to vector<1x64xf32>
    %202 = arith.mulf %201, %185 : vector<1x64xf32>
    %203 = vector.extract_strided_slice %198 {offsets = [0, 0], sizes = [1, 64], strides = [1, 1]} : vector<1x192xf32> to vector<1x64xf32>
    %204 = arith.mulf %203, %200 : vector<1x64xf32>
    %205 = arith.addf %202, %204 : vector<1x64xf32>
    %206 = vector.extract_strided_slice %198 {offsets = [0, 128], sizes = [1, 64], strides = [1, 1]} : vector<1x192xf32> to vector<1x64xf32>
    %207 = math.tanh %205 : vector<1x64xf32>
    %208 = arith.mulf %206, %207 : vector<1x64xf32>
    %c1_115 = arith.constant 1 : index
    %c0_116 = arith.constant 0 : index
    %209 = vector.load %arg20[%c1_115, %c0_116] : memref<4x64xf32, #tpu.memory_space<vmem>>, vector<1x64xf32>
    tpu.vector_store %arg20[%c1_115, %c0_116], %208 {strides = array<i32>} : memref<4x64xf32, #tpu.memory_space<vmem>>, vector<1x64xf32>,
    %c0_117 = arith.constant 0 : index
    %c256_118 = arith.constant 256 : index
    %210 = vector.load %arg18[%c0_117, %c256_118] : memref<4x512xf32, #tpu.memory_space<vmem>>, vector<1x256xf32>
    %cst_119 = arith.constant dense<0.000000e+00> : vector<1x256xf32>
    %211 = tpu.matmul %208, %147, %cst_119 {dimension_numbers = #tpu.dot_dimension_numbers<[1], [0], [0], [1], [0, 0, 1, 1], [], []>} : vector<1x64xf32>, vector<64x256xf32>, vector<1x256xf32> -> vector<1x256xf32>
    %212 = arith.addf %210, %211 : vector<1x256xf32>
    %213 = vector.extract_strided_slice %212 {offsets = [0, 0], sizes = [1, 192], strides = [1, 1]} : vector<1x256xf32> to vector<1x192xf32>
    %214 = arith.negf %213 : vector<1x192xf32>
    %215 = math.exp %214 : vector<1x192xf32>
    %cst_120 = arith.constant 1.000000e+00 : f32
    %216 = vector.broadcast %cst_120 : f32 to vector<1x192xf32>
    %217 = arith.addf %216, %215 : vector<1x192xf32>
    %218 = arith.divf %216, %217 : vector<1x192xf32>
    %219 = vector.extract_strided_slice %212 {offsets = [0, 192], sizes = [1, 64], strides = [1, 1]} : vector<1x256xf32> to vector<1x64xf32>
    %220 = math.tanh %219 : vector<1x64xf32>
    %221 = vector.extract_strided_slice %218 {offsets = [0, 64], sizes = [1, 64], strides = [1, 1]} : vector<1x192xf32> to vector<1x64xf32>
    %222 = arith.mulf %221, %205 : vector<1x64xf32>
    %223 = vector.extract_strided_slice %218 {offsets = [0, 0], sizes = [1, 64], strides = [1, 1]} : vector<1x192xf32> to vector<1x64xf32>
    %224 = arith.mulf %223, %220 : vector<1x64xf32>
    %225 = arith.addf %222, %224 : vector<1x64xf32>
    %226 = vector.extract_strided_slice %218 {offsets = [0, 128], sizes = [1, 64], strides = [1, 1]} : vector<1x192xf32> to vector<1x64xf32>
    %227 = math.tanh %225 : vector<1x64xf32>
    %228 = arith.mulf %226, %227 : vector<1x64xf32>
    %c0_121 = arith.constant 0 : index
    %c0_122 = arith.constant 0 : index
    %229 = vector.load %arg20[%c0_121, %c0_122] : memref<4x64xf32, #tpu.memory_space<vmem>>, vector<1x64xf32>
    tpu.vector_store %arg20[%c0_121, %c0_122], %228 {strides = array<i32>} : memref<4x64xf32, #tpu.memory_space<vmem>>, vector<1x64xf32>,
    %c0_123 = arith.constant 0 : index
    %c0_124 = arith.constant 0 : index
    %230 = vector.load %arg19[%c0_123, %c0_124] : memref<4x64xf32, #tpu.memory_space<vmem>>, vector<4x64xf32>
    %c0_125 = arith.constant 0 : index
    %c0_126 = arith.constant 0 : index
    %231 = vector.load %arg20[%c0_125, %c0_126] : memref<4x64xf32, #tpu.memory_space<vmem>>, vector<4x64xf32>
    %c0_127 = arith.constant 0 : index
    %c0_128 = arith.constant 0 : index
    %232 = vector.load %arg10[%c0_127, %c0_128] : memref<128x1xf32, #tpu.memory_space<vmem>>, vector<128x1xf32>
    %233 = vector.extract_strided_slice %232 {offsets = [0, 0], sizes = [64, 1], strides = [1, 1]} : vector<128x1xf32> to vector<64x1xf32>
    %cst_129 = arith.constant dense<0.000000e+00> : vector<4x1xf32>
    %234 = tpu.matmul %230, %233, %cst_129 {dimension_numbers = #tpu.dot_dimension_numbers<[1], [0], [0], [1], [0, 0, 1, 1], [], []>} : vector<4x64xf32>, vector<64x1xf32>, vector<4x1xf32> -> vector<4x1xf32>
    %235 = vector.extract_strided_slice %232 {offsets = [64, 0], sizes = [64, 1], strides = [1, 1]} : vector<128x1xf32> to vector<64x1xf32>
    %cst_130 = arith.constant dense<0.000000e+00> : vector<4x1xf32>
    %236 = tpu.matmul %231, %235, %cst_130 {dimension_numbers = #tpu.dot_dimension_numbers<[1], [0], [0], [1], [0, 0, 1, 1], [], []>} : vector<4x64xf32>, vector<64x1xf32>, vector<4x1xf32> -> vector<4x1xf32>
    %237 = arith.addf %234, %236 : vector<4x1xf32>
    %c0_131 = arith.constant 0 : index
    %c0_132 = arith.constant 0 : index
    %238 = vector.load %arg11[%c0_131, %c0_132] : memref<1x1xf32, #tpu.memory_space<vmem>>, vector<1x1xf32>
    %239 = vector.broadcast %238 : vector<1x1xf32> to vector<4x1xf32>
    %240 = arith.addf %237, %239 : vector<4x1xf32>
    %cst_133 = arith.constant dense<0xFF800000> : vector<1xf32>
    %241 = vector.multi_reduction <maximumf>, %240, %cst_133 [0] : vector<4x1xf32> to vector<1xf32>
    %242 = vector.shape_cast %241 : vector<1xf32> to vector<1x1xf32>
    %243 = vector.broadcast %242 : vector<1x1xf32> to vector<4x1xf32>
    %244 = arith.subf %240, %243 : vector<4x1xf32>
    %245 = math.exp %244 : vector<4x1xf32>
    %cst_134 = arith.constant dense<0.000000e+00> : vector<1xf32>
    %246 = vector.multi_reduction <add>, %245, %cst_134 [0] : vector<4x1xf32> to vector<1xf32>
    %247 = vector.shape_cast %246 : vector<1xf32> to vector<1x1xf32>
    %248 = tpu.reciprocal %247 {approx = true} : vector<1x1xf32> -> vector<1x1xf32>
    %249 = vector.broadcast %248 : vector<1x1xf32> to vector<4x1xf32>
    %250 = arith.mulf %245, %249 : vector<4x1xf32>
    %251 = vector.broadcast %250 : vector<4x1xf32> to vector<4x64xf32>
    %252 = arith.mulf %251, %230 : vector<4x64xf32>
    %cst_135 = arith.constant dense<0.000000e+00> : vector<64xf32>
    %253 = vector.multi_reduction <add>, %252, %cst_135 [0] : vector<4x64xf32> to vector<64xf32>
    %254 = vector.shape_cast %253 : vector<64xf32> to vector<1x64xf32>
    %255 = vector.broadcast %250 : vector<4x1xf32> to vector<4x64xf32>
    %256 = arith.mulf %255, %231 : vector<4x64xf32>
    %cst_136 = arith.constant dense<0.000000e+00> : vector<64xf32>
    %257 = vector.multi_reduction <add>, %256, %cst_136 [0] : vector<4x64xf32> to vector<64xf32>
    %258 = vector.shape_cast %257 : vector<64xf32> to vector<1x64xf32>
    %c0_137 = arith.constant 0 : index
    %c0_138 = arith.constant 0 : index
    %259 = vector.load %arg12[%c0_137, %c0_138] : memref<128x4xf32, #tpu.memory_space<vmem>>, vector<128x4xf32>
    %260 = vector.extract_strided_slice %259 {offsets = [0, 0], sizes = [64, 4], strides = [1, 1]} : vector<128x4xf32> to vector<64x4xf32>
    %cst_139 = arith.constant dense<0.000000e+00> : vector<1x4xf32>
    %261 = tpu.matmul %254, %260, %cst_139 {dimension_numbers = #tpu.dot_dimension_numbers<[1], [0], [0], [1], [0, 0, 1, 1], [], []>} : vector<1x64xf32>, vector<64x4xf32>, vector<1x4xf32> -> vector<1x4xf32>
    %262 = vector.extract_strided_slice %259 {offsets = [64, 0], sizes = [64, 4], strides = [1, 1]} : vector<128x4xf32> to vector<64x4xf32>
    %cst_140 = arith.constant dense<0.000000e+00> : vector<1x4xf32>
    %263 = tpu.matmul %258, %262, %cst_140 {dimension_numbers = #tpu.dot_dimension_numbers<[1], [0], [0], [1], [0, 0, 1, 1], [], []>} : vector<1x64xf32>, vector<64x4xf32>, vector<1x4xf32> -> vector<1x4xf32>
    %264 = arith.addf %261, %263 : vector<1x4xf32>
    %c0_141 = arith.constant 0 : index
    %c0_142 = arith.constant 0 : index
    %265 = vector.load %arg13[%c0_141, %c0_142] : memref<1x4xf32, #tpu.memory_space<vmem>>, vector<1x4xf32>
    %266 = arith.addf %264, %265 : vector<1x4xf32>
    %c0_143 = arith.constant 0 : index
    %c0_144 = arith.constant 0 : index
    %c0_145 = arith.constant 0 : index
    %267 = vector.load %arg14[%c0_143, %c0_144, %c0_145] : memref<1x1x4xf32, #tpu.memory_space<vmem>>, vector<1x1x4xf32>
    %268 = vector.shape_cast %267 : vector<1x1x4xf32> to vector<1x4xf32>
    %269 = vector.shape_cast %266 : vector<1x4xf32> to vector<1x1x4xf32>
    tpu.vector_store %arg14[%c0_143, %c0_144, %c0_145], %269 {strides = array<i32>} : memref<1x1x4xf32, #tpu.memory_space<vmem>>, vector<1x1x4xf32>,
    return
  }
  func.func @transform_0(%arg0: i32) -> (i32, i32, i32) {
    %c0_i32 = arith.constant 0 : i32
    %c0_i32_0 = arith.constant 0 : i32
    %c0_i32_1 = arith.constant 0 : i32
    return %arg0, %c0_i32, %c0_i32_0 : i32, i32, i32
  }
  func.func @transform_1(%arg0: i32) -> (i32, i32, i32) {
    %c0_i32 = arith.constant 0 : i32
    %c0_i32_0 = arith.constant 0 : i32
    %c0_i32_1 = arith.constant 0 : i32
    %c0_i32_2 = arith.constant 0 : i32
    return %c0_i32, %c0_i32_0, %c0_i32_1 : i32, i32, i32
  }
  func.func @transform_2(%arg0: i32) -> (i32, i32) {
    %c0_i32 = arith.constant 0 : i32
    %c0_i32_0 = arith.constant 0 : i32
    %c0_i32_1 = arith.constant 0 : i32
    return %c0_i32, %c0_i32_0 : i32, i32
  }
  func.func @transform_3(%arg0: i32) -> (i32, i32, i32) {
    %c0_i32 = arith.constant 0 : i32
    %c0_i32_0 = arith.constant 0 : i32
    %c0_i32_1 = arith.constant 0 : i32
    %c0_i32_2 = arith.constant 0 : i32
    return %c0_i32, %c0_i32_0, %c0_i32_1 : i32, i32, i32
  }
  func.func @transform_4(%arg0: i32) -> (i32, i32) {
    %c0_i32 = arith.constant 0 : i32
    %c0_i32_0 = arith.constant 0 : i32
    %c0_i32_1 = arith.constant 0 : i32
    return %c0_i32, %c0_i32_0 : i32, i32
  }
  func.func @transform_5(%arg0: i32) -> (i32, i32) {
    %c0_i32 = arith.constant 0 : i32
    %c0_i32_0 = arith.constant 0 : i32
    %c0_i32_1 = arith.constant 0 : i32
    return %c0_i32, %c0_i32_0 : i32, i32
  }
  func.func @transform_6(%arg0: i32) -> (i32, i32) {
    %c0_i32 = arith.constant 0 : i32
    %c0_i32_0 = arith.constant 0 : i32
    %c0_i32_1 = arith.constant 0 : i32
    return %c0_i32, %c0_i32_0 : i32, i32
  }
  func.func @transform_7(%arg0: i32) -> (i32, i32) {
    %c0_i32 = arith.constant 0 : i32
    %c0_i32_0 = arith.constant 0 : i32
    %c0_i32_1 = arith.constant 0 : i32
    return %c0_i32, %c0_i32_0 : i32, i32
  }
  func.func @transform_8(%arg0: i32) -> (i32, i32) {
    %c0_i32 = arith.constant 0 : i32
    %c0_i32_0 = arith.constant 0 : i32
    %c0_i32_1 = arith.constant 0 : i32
    return %c0_i32, %c0_i32_0 : i32, i32
  }
  func.func @transform_9(%arg0: i32) -> (i32, i32) {
    %c0_i32 = arith.constant 0 : i32
    %c0_i32_0 = arith.constant 0 : i32
    %c0_i32_1 = arith.constant 0 : i32
    return %c0_i32, %c0_i32_0 : i32, i32
  }
  func.func @transform_10(%arg0: i32) -> (i32, i32) {
    %c0_i32 = arith.constant 0 : i32
    %c0_i32_0 = arith.constant 0 : i32
    %c0_i32_1 = arith.constant 0 : i32
    return %c0_i32, %c0_i32_0 : i32, i32
  }
  func.func @transform_11(%arg0: i32) -> (i32, i32) {
    %c0_i32 = arith.constant 0 : i32
    %c0_i32_0 = arith.constant 0 : i32
    %c0_i32_1 = arith.constant 0 : i32
    return %c0_i32, %c0_i32_0 : i32, i32
  }
  func.func @transform_12(%arg0: i32) -> (i32, i32) {
    %c0_i32 = arith.constant 0 : i32
    %c0_i32_0 = arith.constant 0 : i32
    %c0_i32_1 = arith.constant 0 : i32
    return %c0_i32, %c0_i32_0 : i32, i32
  }
  func.func @transform_13(%arg0: i32) -> (i32, i32, i32) {
    %c0_i32 = arith.constant 0 : i32
    %c0_i32_0 = arith.constant 0 : i32
    %c0_i32_1 = arith.constant 0 : i32
    return %arg0, %c0_i32, %c0_i32_0 : i32, i32, i32
  }
}

</mosaic_0001>

<bundles_post_ra>
// kernel: respiratory_forward.1
= control target key start
LH: loop header
LB: loop body
LE: loop exit
PB: predicated region body
PF: predicated region fallthrough
CT: control target
= control target key end

     0   :  { %s4122_s0 = inlined_call_operand.vmem [shape: f32[2,18,24], index: 0, kind: input, shape index: {}]   ;;  %s4123_s1 = inlined_call_operand.hbm [shape: f32[3,24,32], index: 1, kind: input, shape index: {}]   ;;  %s4124_s2 = inlined_call_operand.vmem [shape: f32[1,32], index: 2, kind: input, shape index: {}]   ;;  %s4125_s3 = inlined_call_operand.vmem [shape: f32[3,32,64], index: 3, kind: input, shape index: {}]   ;;  %s4126_s4 = inlined_call_operand.vmem [shape: f32[1,64], index: 4, kind: input, shape index: {}]   ;;  %s4127_s5 = inlined_call_operand.vmem [shape: f32[64,512], index: 5, kind: input, shape index: {}]   ;;  %s4128_s6 = inlined_call_operand.vmem [shape: f32[1,512], index: 6, kind: input, shape index: {}]   ;;  %s4129_s7 = inlined_call_operand.hbm [shape: f32[64,256], index: 7, kind: input, shape index: {}]   ;;  %s4130_s8 = inlined_call_operand.hbm [shape: f32[64,256], index: 8, kind: input, shape index: {}]   ;;  %s4131_s9 = inlined_call_operand.vmem [shape: f32[128,1], index: 9, kind: input, shape index: {}]   ;;  %s4132_s10 = inlined_call_operand.<no memory space> [shape: f32[1,1], index: 10, kind: input, shape index: {}]   ;;  %s4133_s11 = inlined_call_operand.vmem [shape: f32[128,4], index: 11, kind: input, shape index: {}]   ;;  %s4134_s12 = inlined_call_operand.vmem [shape: f32[1,4], index: 12, kind: input, shape index: {}]   ;;  %s4135_s13 = inlined_call_operand.hbm [shape: f32[2,1,4], index: 13, kind: output, shape index: {}]  }
   0x1   :  { %v18_v0 = vstv %s4132_s10 }
   0x2   :  { %19 = vst [vmem:[#allocation8] sm:$0x1] %v18_v0 }
   0x3   :  { %20 = vsyncpa [#allocation10], 0 }
   0x4   :  { %21 = vsyncpa [#allocation13], 0 }
   0x5   :  { %22 = vsyncpa [#allocation11], 0 }
   0x6   :  { %24 = vsyncpa [#allocation11 + $0x1], 0  ;;  %s3369_s27 = smov 0   ;;  %s3371_s28 = smov 0  }
   0x7   :  { %s3373_s29 = smov 0   ;;  %s3375_s30 = smov 0  }
   0x8 LB: > { %4140 = sst [smem:[#allocation19_spill]] %s3277_s29  ;;  %s3390_s10 = sadd.s32 4294967295, %s3281_s30   ;;  %s3281_s30 = sphi %s3375_s30, %s4149_s30   ;;  %s3277_s29 = sphi %s3373_s29, %s4151_s29   ;;  %s3273_s28 = sphi %s3371_s28, %s4153_s28   ;;  %s3269_s27 = sphi %s3369_s27, %s4152_s27  }
   0x9   : > { %s2730_s14 = sadd.s32 4294967294, %s3281_s30   ;;  %s3394_s15 = sadd.s32 1, %s3281_s30  }
   0xa   : > { %4141 = sst [smem:[#allocation20_spill]] %s3394_s15  ;;  %s315_s16 = sadd.s32 1, %s3277_s29 }
   0xb   : > { %s312_s17 = ssub.s32 %s3281_s30, %s3394_s15  ;;  %p325_p0 = scmp.ne.s32.totalorder %s3277_s29, %s3273_s28 }
   0xc   : > { %p313_p1 = scmp.eq.s32.totalorder %s312_s17, 0  ;;  %p326_p2 = scmp.eq.s32.totalorder %s3390_s10, 1 }
   0xd   : > { %p331_p3 = scmp.ne.s32.totalorder %s3273_s28, %s3269_s27  ;;  %p332_p4 = scmp.eq.s32.totalorder %s2730_s14, 1 }
   0xe   : > { %s3405_s18 = scalar_select %p313_p1, %s3277_s29, %s315_s16  }
   0xf   : > { %p3407_p5 = por %p326_p2, %p325_p0  ;;  %p3411_p6 = por %p332_p4, %p331_p3 }
  0x10   : > { %4142 = sst [smem:[#allocation21_spill]] %s3405_s18  ;;  %p2731_p7 = scmp.ge.s32.totalorder %s3281_s30, 1 }
  0x11   : > { %s4144_s20 = scalar_select %p3411_p6, 1, 0 }
  0x12   : > { %p339_p8 = scmp.lt.s32.totalorder %s3281_s30, 3  ;;  %p3015_p9 = scmp.eq.s32.totalorder %s3390_s10, 0 }
  0x13   : > { %4145 = sst [smem:[#allocation22_spill]] %s4144_s20  ;;  %s3283_s22 = smov [#allocation12]  }
  0x14   : > { %p3418_p10 = pnand %p2731_p7, %p339_p8  ;;  %s379_s23 = sshll.u32 %s3283_s22, 4  ;;  %s380_s23 = int_to_ptr.vmem [resolvable:$true] %s379_s23 }
  0x15   : > { %s3284_s25 = smov [#allocation9]   ;;  %s3146_s14 = scalar_lea.vmem %s380_s23, 2048 }
  0x16   : > { %p3001_p11 = pneg %p3418_p10  ;;  %s351_s26 = sshll.u32 %s3284_s25, 4  ;;  %s352_s26 = int_to_ptr.vmem [resolvable:$true] %s351_s26 }
  0x17   : > { %p3147_p0 = scmp.ne.s32.totalorder %s380_s23, %s3146_s14  ;;  %p3154_p3 = scmp.lt.s32.totalorder %s380_s23, %s380_s23 }
  0x18   : > { %p3426_p12 = pnand %p3015_p9, %p3001_p11  ;;  %p3155_p4 = scmp.lt.s32.totalorder %s3146_s14, %s3146_s14 }
  0x1a   : > { %p3137_p13 = pneg %p3426_p12  ;;  %p3156_p7 = por %p3155_p4, %p3154_p3 }
  0x1c   : > { %p3149_p1 = pnand %p3147_p0, %p3137_p13 }
  0x1e   : > { %p3150_p2 = pneg %p3149_p1 }
  0x20   : > { %p3157_p8 = pnand %p3156_p7, %p3150_p2 }
  0x22   : > { %3160 = shalt.err (!%p3157_p8)
}
  0x23   : > { %s3285_s16 = smov 256   ;;  %s3286_s17 = smov 16  }
  0x24   : > { %3007 = dma.hbm_to_vmem [thread:$0]  (!%p3426_p12), %s4129_s7, 2048, %s380_s23, [#allocation13], %s3285_s16, %s3285_s16, %s3286_s17  }
  0x25   : > { %s3172_s18 = scalar_lea.vmem %s352_s26, 1152  ;;  %p3180_p2 = scmp.lt.s32.totalorder %s352_s26, %s352_s26 }
  0x26   : > { %p3173_p11 = scmp.ne.s32.totalorder %s352_s26, %s3172_s18  ;;  %p3181_p3 = scmp.lt.s32.totalorder %s3172_s18, %s3172_s18 }
  0x28   : > { %p3175_p0 = pnand %p3173_p11, %p3137_p13  ;;  %p3182_p4 = por %p3181_p3, %p3180_p2 }
  0x2a   : > { %p3176_p1 = pneg %p3175_p0 }
  0x2c   : > { %p3183_p7 = pnand %p3182_p4, %p3176_p1 }
  0x2e   : > { %3186 = shalt.err (!%p3183_p7)
}
  0x2f   : > { %s3287_s14 = smov 128   ;;  %s3288_s29 = smov 8  }
  0x30   : > { %3004 = dma.hbm_to_vmem [thread:$0]  (!%p3426_p12), %s4123_s1, 1152, %s352_s26, [#allocation10], %s3287_s14, %s3287_s14, %s3288_s29  }
  0x31   : > { %s3289_s23 = smov [#allocation14]  }
  0x32   : > { %s392_s22 = sshll.u32 %s3289_s23, 4  ;;  %s393_s22 = int_to_ptr.vmem [resolvable:$true] %s392_s22 }
  0x33   : > { %s3198_s25 = scalar_lea.vmem %s393_s22, 2048  ;;  %p3206_p1 = scmp.lt.s32.totalorder %s393_s22, %s393_s22 }
  0x34   : > { %p3199_p8 = scmp.ne.s32.totalorder %s393_s22, %s3198_s25  ;;  %p3207_p2 = scmp.lt.s32.totalorder %s3198_s25, %s3198_s25 }
  0x36   : > { %p3201_p11 = pnand %p3199_p8, %p3137_p13  ;;  %p3208_p3 = por %p3207_p2, %p3206_p1 }
  0x38   : > { %p3202_p0 = pneg %p3201_p11 }
  0x3a   : > { %p3209_p4 = pnand %p3208_p3, %p3202_p0 }
  0x3c   : > { %3212 = shalt.err (!%p3209_p4)
}
  0x3d   : > { %3010 = dma.hbm_to_vmem [thread:$0]  (!%p3426_p12), %s4130_s8, 2048, %s393_s22, [#allocation13], %s3285_s16, %s3285_s16, %s3286_s17  }
  0x3e   : > { %428 = sbr.rel (%p3418_p10) target bundleno = 4672 (0x1240), region = 72 }
  0x43   : > { %3256 = dma.done.wait (%p3015_p9), [#allocation10], 1152  }
  0x44   : > { %3258 = vsyncadd (%p3015_p9), [#allocation10], 4294966144 }
  0x45   : > { %3260 = dma.done.wait (%p3015_p9), [#allocation13], 4096  }
  0x46   : > { %3262 = vsyncadd (%p3015_p9), [#allocation13], 4294963200  ;;  %p479_p13 = scmp.lt.s32.totalorder %s3390_s10, 1  ;;  %v494_v1 = vld [vmem:[#allocation9 + $0x28] sm:$0xff]  ;;  %v488_v2 = vld [vmem:[#allocation9 + $0x10] sm:$0xff]  ;;  %vm495_vm0 = vcmask 195584  }
  0x47   : > { %v493_v3 = vld [vmem:[#allocation9 + $0x20] sm:$0xff]  ;;  %2850 = vmatprep.subr.mxu0 %v494_v1  ;;  %2859 = vmatprep.subr.mxu1 %v488_v2  ;;  %v487_v4 = vld [vmem:[#allocation9 + $0x8] sm:$0xff]  ;;  %v492_v5 = vld [vmem:[#allocation9 + $0x18] sm:$0xff]  ;;  %v3290_v16 = vmov 0.0   ;;  %vm765_vm1 = vcmask 253952   ;;  %vm3291_vm2 = vmmov 0  }
  0x48   : > { %s480_s18 = scalar_select %p479_p13, %s3390_s10, 1  ;;  %2851 = vmatpush3.msra.mxu0 %v494_v1  ;;  %2860 = vmatpush3.msra.mxu1 %v488_v2  ;;  %v486_v6 = vld [vmem:[#allocation9] sm:$0xff]  ;;  %v662_v13 = vld [vmem:[#allocation9 + $0x38] sm:$0xff]  ;;  %v661_v14 = vld [vmem:[#allocation9 + $0x30] sm:$0xff]  ;;  %766 = vst.msk [vmem:[#allocation3] sm:$0x1] %vm765_vm1, %v3290_v16 }
  0x49   : > { %2852 = vmatprep.subr.mxu0 %v493_v3  ;;  %2861 = vmatprep.subr.mxu1 %v487_v4  ;;  %v663_v11 = vld [vmem:[#allocation9 + $0x40] sm:$0xff]  ;;  %v2751_v17 = vld [vmem:[%s4125_s3 + $0x38] sm:$0xff]  ;;  %v2750_v19 = vld [vmem:[%s4125_s3 + $0x30] sm:$0xff]  ;;  %767 = vst.msk [vmem:[#allocation3 + $0x9] sm:$0x1] %vm765_vm1, %v3290_v16  ;;  %vm758_vm3 = vcmask 261120  }
  0x4a   : > { %s2986_s20 = smul.u32 24, %s480_s18  ;;  %2853 = vmatpush3.msra.mxu0 %v493_v3  ;;  %2862 = vmatpush3.msra.mxu1 %v487_v4  ;;  %v773_v18 = vld [vmem:[%s4125_s3 + $0x18] sm:$0xff]  ;;  %v772_v20 = vld [vmem:[%s4125_s3 + $0x10] sm:$0xff]  ;;  %v2749_v21 = vld [vmem:[%s4125_s3 + $0x28] sm:$0xff]  ;;  %vm1015_vm4 = vcmask 523264   ;;  %s3293_s23 = smov 64  }
  0x4b   : > { %2854 = vmatprep.subr.mxu0 %v492_v5  ;;  %2863 = vmatprep.subr.mxu1 %v486_v6  ;;  %v771_v22 = vld [vmem:[%s4125_s3 + $0x8] sm:$0xff]  ;;  %v2748_v23 = vld [vmem:[%s4125_s3 + $0x20] sm:$0xff]  ;;  %v2757_v43 = vld [vmem:[%s4125_s3 + $0x58] sm:$0xff]  ;;  %vm1368_vm5 = vcmask 516096   ;;  %vm2423_vm6 = vcmask 3072   ;;  %vm2449_vm7 = vcmask 519168  }
  0x4c   : > { %s3477_s26 = scalar_lea.vmem %s4122_s0, %s2986_s20  ;;  %2855 = vmatpush3.msra.mxu0 %v492_v5  ;;  %2864 = vmatpush3.msra.mxu1 %v486_v6  ;;  %v770_v24 = vld [vmem:[%s4125_s3] sm:$0xff]  ;;  %v2756_v46 = vld [vmem:[%s4125_s3 + $0x50] sm:$0xff]  ;;  %v2755_v47 = vld [vmem:[%s4125_s3 + $0x48] sm:$0xff]  ;;  %s477_s25 = sand.u32 1, %s3273_s28   ;;  %vm2629_vm8 = vcmask 24576  }
  0x4d   : > { %v489_v7 = vld [vmem:[%s3477_s26 + $0x1] sm:$0xff]  ;;  %v490_v9 = vld [vmem:[%s3477_s26 + $0x9] sm:$0xff]  ;;  %2868 = vmatprep.subr.mxu0 %v663_v11  ;;  %2877 = vmatprep.subr.mxu1 %v3290_v16  ;;  %v2747_v31 = vld [vmem:[%s4124_s2] ss:$0 sm:$0xff]  ;;  %s2781_s18 = sshll.u32 %s3390_s10, 4  ;;  %s478_s20 = scalar_lea.vmem [#allocation15], %s477_s25 }
  0x4e   : > { %v484_v8 = vld [vmem:[%s3477_s26] sm:$0xff]  ;;  %v485_v10 = vld [vmem:[%s3477_s26 + $0x8] sm:$0xff]  ;;  %2856 = vmatprep.mubr.msk.f32.mxu0 %vm495_vm0, %v489_v7  ;;  %v1052_v52 = vld [vmem:[%s4127_s5 + $0xf8] sm:$0xff]  ;;  %s2644_s21 = sshll.u32 %s478_s20, 4  ;;  %s2632_s16 = scalar_lea.sflag [#allocation11], %s477_s25  ;;  %s2645_s21 = int_to_ptr.vmem [resolvable:$true] %s2644_s21 }
  0x4f   : > { %v658_v12 = vld [vmem:[%s3477_s26 + $0x2] sm:$0xff]  ;;  %2865 = vmatprep.mubr.msk.f32.mxu1 %vm495_vm0, %v484_v8  ;;  %2857 = vmatmul.mubr.msk.f32.vlgmr.msra.gmra.mxu0 %vm495_vm0, %v490_v9  ;;  %v659_v15 = vld [vmem:[%s3477_s26 + $0xa] sm:$0xff]  ;;  %v1048_v56 = vld [vmem:[%s4127_s5 + $0xd8] sm:$0xff]  ;;  %s2642_s26 = scalar_lea.hbm %s4135_s13, %s2781_s18  ;;  %s3213_s17 = scalar_lea.vmem %s2645_s21, 16 }
  0x50   : > { %2866 = vmatmul.mubr.msk.f32.vlgmr.msra.gmra.mxu1 %vm495_vm0, %v485_v10  ;;  %2874 = vmatprep.mubr.msk.f32.mxu0 %vm495_vm0, %v658_v12  ;;  %v2754_v48 = vld [vmem:[%s4125_s3 + $0x40] sm:$0xff]  ;;  %v1050_v50 = vld [vmem:[%s4127_s5 + $0xe8] sm:$0xff]  ;;  %v1051_v54 = vld [vmem:[%s4127_s5 + $0xf0] sm:$0xff]  ;;  %p3214_p9 = scmp.ne.s32.totalorder %s2645_s21, %s3213_s17  ;;  %s3295_s10 = smov [#allocation15]  }
  0x51   : > { %2869 = vmatpush3.msra.mxu0 %v663_v11  ;;  %2878 = vmatpush3.msra.mxu1 %v2751_v17  ;;  %v1049_v51 = vld [vmem:[%s4127_s5 + $0xe0] sm:$0xff]  ;;  %v1046_v53 = vld [vmem:[%s4127_s5 + $0xc8] sm:$0xff]  ;;  %v1047_v58 = vld [vmem:[%s4127_s5 + $0xd0] sm:$0xff]  ;;  %s3217_s14 = sshll.u32 %s3295_s10, 4  ;;  %s3218_s14 = int_to_ptr.vmem [resolvable:$false] %s3217_s14 }
  0x52   : > { %2870 = vmatprep.subr.mxu0 %v662_v13  ;;  %2879 = vmatprep.subr.mxu1 %v3290_v16  ;;  %v1045_v55 = vld [vmem:[%s4127_s5 + $0xc0] sm:$0xff]  ;;  %v1042_v57 = vld [vmem:[%s4127_s5 + $0xa8] sm:$0xff]  ;;  %v1044_v60 = vld [vmem:[%s4127_s5 + $0xb8] sm:$0xff]  ;;  %p3215_p10 = pnand %p3214_p9, %p3407_p5  ;;  %s3219_s22 = scalar_lea.vmem %s3218_s14, 32 }
  0x53   : > { %2871 = vmatpush3.msra.mxu0 %v662_v13  ;;  %2880 = vmatpush3.msra.mxu1 %v2750_v19  ;;  %v1041_v59 = vld [vmem:[%s4127_s5 + $0xa0] sm:$0xff]  ;;  %v1038_v61 = vld [vmem:[%s4127_s5 + $0x88] sm:$0xff]  ;;  %v1043_v62 = vld [vmem:[%s4127_s5 + $0xb0] sm:$0xff]  ;;  %p3220_p7 = scmp.lt.s32.totalorder %s2645_s21, %s3218_s14  ;;  %p3221_p8 = scmp.lt.s32.totalorder %s3219_s22, %s3213_s17 }
  0x54   : > { %2872 = vmatprep.subr.mxu0 %v661_v14  ;;  %2881 = vmatprep.subr.mxu1 %v3290_v16  ;;  %v1037_v63 = vld [vmem:[%s4127_s5 + $0x80] sm:$0xff]  ;;  %v1040_v0 = vld [vmem:[%s4127_s5 + $0x98] sm:$0xff]  ;;  %v1034_v1 = vld [vmem:[%s4127_s5 + $0x68] sm:$0xff]  ;;  %p3216_p12 = pneg %p3215_p10 }
  0x55   : > { %2873 = vmatpush3.msra.mxu0 %v661_v14  ;;  %2882 = vmatpush3.msra.mxu1 %v2749_v21  ;;  %v1039_v2 = vld [vmem:[%s4127_s5 + $0x90] sm:$0xff]  ;;  %v1033_v3 = vld [vmem:[%s4127_s5 + $0x60] sm:$0xff]  ;;  %v1036_v4 = vld [vmem:[%s4127_s5 + $0x78] sm:$0xff]  ;;  %p3222_p11 = por %p3221_p8, %p3220_p7 }
  0x56   : > { %2875 = vmatmul.mubr.msk.f32.vlgmr.msra.gmra.mxu0 %vm495_vm0, %v659_v15  ;;  %2888 = vmatprep.subr.mxu0 %v3290_v16  ;;  %v1030_v5 = vld [vmem:[%s4127_s5 + $0x48] sm:$0xff]  ;;  %v1035_v6 = vld [vmem:[%s4127_s5 + $0x70] sm:$0xff]  ;;  %v1029_v7 = vld [vmem:[%s4127_s5 + $0x40] sm:$0xff] }
  0x57   : > { %2889 = vmatpush3.msra.mxu0 %v773_v18  ;;  %2883 = vmatprep.subr.mxu1 %v3290_v16  ;;  %v1032_v8 = vld [vmem:[%s4127_s5 + $0x58] sm:$0xff]  ;;  %v1026_v9 = vld [vmem:[%s4127_s5 + $0x28] sm:$0xff]  ;;  %v1031_v10 = vld [vmem:[%s4127_s5 + $0x50] sm:$0xff]  ;;  %p3223_p0 = pnand %p3222_p11, %p3216_p12 }
  0x58   : > { %2890 = vmatprep.subr.mxu0 %v3290_v16  ;;  %2884 = vmatpush3.msra.mxu1 %v2748_v23  ;;  %v1025_v11 = vld [vmem:[%s4127_s5 + $0x20] sm:$0xff]  ;;  %v1028_v12 = vld [vmem:[%s4127_s5 + $0x38] sm:$0xff]  ;;  %v1022_v13 = vld [vmem:[%s4127_s5 + $0x8] sm:$0xff] }
  0x59   : > { %2891 = vmatpush3.msra.mxu0 %v772_v20  ;;  %2885 = vmatprep.mubr.msk.f32.mxu1 %vm3291_vm2, %v3290_v16  ;;  %v1027_v14 = vld [vmem:[%s4127_s5 + $0x30] sm:$0xff]  ;;  %v1021_v15 = vld [vmem:[%s4127_s5] sm:$0xff]  ;;  %v1024_v17 = vld [vmem:[%s4127_s5 + $0x18] sm:$0xff] }
  0x5a   : > { %2892 = vmatprep.subr.mxu0 %v3290_v16  ;;  %2896 = vmatprep.mubr.msk.f32.mxu0 %vm3291_vm2, %v3290_v16  ;;  %v1023_v18 = vld [vmem:[%s4127_s5 + $0x10] sm:$0xff]  ;;  %v3654_v19 = vld [vmem:[#allocation12 + $0x78] sm:$0xff] }
  0x5b   : > { %2893 = vmatpush3.msra.mxu0 %v771_v22  ;;  %2899 = vmatprep.subr.mxu1 %v3290_v16 }
  0x5c   : > { %2894 = vmatprep.subr.mxu0 %v3290_v16 }
  0x5d   : > { %2895 = vmatpush3.msra.mxu0 %v770_v24 }
  0x5e   : > { %1094 = vmatprep.subr.mxu0 %v1050_v50 }
 0x10f   : > { %v2858_v25 = vpop.f32.mrf.mxu0 }
 0x110   : > { %v2867_v26 = vpop.f32.mrf.mxu1 }
 0x111   : > { %v568_v27 = vpop.f32.mrf.mxu0  ;;  %v655_v29 = vadd.f32 %v2867_v26, %v2858_v25  ;;  %v2759_v26 = vld [vmem:[%s4126_s4] ss:$0 sm:$0xff] }
 0x112   : > { %v649_v28 = vpop.f32.mrf.mxu1 }
 0x113   : > { %v650_v32 = vadd.f32 %v649_v28, %v568_v27 }
 0x116   : > { %v2876_v30 = vpop.f32.mrf.mxu0 }
 0x117   : > { %v746_v33 = vadd.f32 %v2876_v30, %v655_v29 }
 0x118   : > { %v736_v34 = vpop.f32.mrf.mxu0 }
 0x119   : > { %v755_v35 = vadd.f32 %v2747_v31, %v746_v33  ;;  %v745_v36 = vadd.f32 %v736_v34, %v650_v32  ;;  %v3662_v34 = vld [vmem:[#allocation12 + $0x70] sm:$0xff] }
 0x11b   : > { %v757_v37 = vmax.f32 %v755_v35, 0.0  ;;  %v754_v38 = vadd.f32 %v2747_v31, %v745_v36  ;;  %v3664_v35 = vld [vmem:[#allocation12 + $0x68] sm:$0xff]  ;;  %v3668_v36 = vld [vmem:[#allocation12 + $0x60] sm:$0xff] }
 0x11d   : > { %760 = vst.msk [vmem:[#allocation2 + $0x8] sm:$0xff] %vm758_vm3, %v757_v37  ;;  %v756_v39 = vmax.f32 %v754_v38, 0.0  ;;  %v3671_v37 = vld [vmem:[#allocation12 + $0x58] sm:$0xff]  ;;  %v3675_v38 = vld [vmem:[#allocation12 + $0x50] sm:$0xff] }
 0x11f   : > { %759 = vst.msk [vmem:[#allocation2] sm:$0xff] %vm758_vm3, %v756_v39  ;;  %v3679_v39 = vld [vmem:[#allocation12 + $0x48] sm:$0xff] }
 0x126   : > { %v761_v40 = vld [vmem:[#allocation2] ss:$2 sm:$0xff]  ;;  %v763_v41 = vld [vmem:[#allocation2 + $0x1] ss:$2 sm:$0xff] }
 0x127   : > { %v764_v42 = vmax.f32 %v761_v40, %v763_v41  ;;  %v3683_v40 = vld [vmem:[#allocation12 + $0x40] sm:$0xff]  ;;  %v3687_v41 = vld [vmem:[#allocation12 + $0x38] sm:$0xff] }
 0x129   : > { %768 = vst.msk [vmem:[#allocation3 + $0x1] sm:$0xff] %vm758_vm3, %v764_v42  ;;  %v3691_v42 = vld [vmem:[#allocation12 + $0x30] sm:$0xff] }
 0x130   : > { %v774_v44 = vld [vmem:[#allocation3 + $0x1] sm:$0xff] }
 0x131   : > { %v769_v45 = vld [vmem:[#allocation3] sm:$0xff]  ;;  %2886 = vmatmul.mubr.msk.f32.vlgmr.msra.gmra.mxu1 %vm758_vm3, %v774_v44 }
 0x132   : > { %2897 = vmatmul.mubr.msk.f32.vlgmr.msra.gmra.mxu0 %vm758_vm3, %v769_v45  ;;  %2900 = vmatpush3.msra.mxu1 %v2757_v43  ;;  %v926_v49 = vld [vmem:[#allocation3 + $0x2] sm:$0xff]  ;;  %v3699_v44 = vld [vmem:[#allocation12 + $0x20] sm:$0xff]  ;;  %v3703_v45 = vld [vmem:[#allocation12 + $0x18] sm:$0xff] }
 0x133   : > { %2907 = vmatprep.mubr.msk.f32.mxu1 %vm3291_vm2, %v3290_v16  ;;  %2901 = vmatprep.subr.mxu1 %v3290_v16  ;;  %v3695_v43 = vld [vmem:[#allocation12 + $0x28] sm:$0xff] }
 0x134   : > { %1142 = vmatprep.mubr.f32.mxu0 %v3290_v16  ;;  %2902 = vmatpush3.msra.mxu1 %v2756_v46  ;;  %v3707_v46 = vld [vmem:[#allocation12 + $0x10] sm:$0xff] }
 0x135   : > { %2903 = vmatprep.subr.mxu1 %v3290_v16  ;;  %1095 = vmatpush1.msra.mxu0 %v1049_v51 }
 0x136   : > { %2904 = vmatpush3.msra.mxu1 %v2755_v47  ;;  %1096 = vmatprep.subr.mxu0 %v1046_v53  ;;  %v3711_v47 = vld [vmem:[#allocation12 + $0x8] sm:$0xff] }
 0x137   : > { %2905 = vmatprep.subr.mxu1 %v3290_v16  ;;  %1097 = vmatpush1.msra.mxu0 %v1045_v55  ;;  %v1053_v55 = vld [vmem:[%s4128_s6] sm:$0xf] }
 0x138   : > { %2906 = vmatpush3.msra.mxu1 %v2754_v48  ;;  %1098 = vmatprep.subr.mxu0 %v1042_v57  ;;  %v3715_v48 = vld [vmem:[#allocation12] sm:$0xff] }
 0x139   : > { %2908 = vmatmul.mubr.msk.f32.vlgmr.msra.gmra.mxu1 %vm758_vm3, %v926_v49  ;;  %1165 = vmatprep.subr.mxu1 %v1052_v52  ;;  %v1055_v49 = vlaneseq }
 0x13a   : > { %1213 = vmatprep.mubr.f32.mxu1 %v3290_v16  ;;  %1166 = vmatpush1.msra.mxu1 %v1051_v54 }
 0x13b   : > { %1167 = vmatprep.subr.mxu1 %v1048_v56  ;;  %1099 = vmatpush1.msra.mxu0 %v1041_v59  ;;  %v1056_v50 = vshrl.u32 %v1055_v49, 7 }
 0x13c   : > { %1168 = vmatpush1.msra.mxu1 %v1047_v58  ;;  %1100 = vmatprep.subr.mxu0 %v1038_v61 }
 0x13d   : > { %1169 = vmatprep.subr.mxu1 %v1044_v60  ;;  %1101 = vmatpush1.msra.mxu0 %v1037_v63  ;;  %v1057_v51 = vsub.s32 0, %v1056_v50  ;;  %v1065_v52 = vsub.s32 2, %v1056_v50  ;;  %v1061_v53 = vsub.s32 1, %v1056_v50  ;;  %v1069_v54 = vsub.s32 3, %v1056_v50 }
 0x13e   : > { %1170 = vmatpush1.msra.mxu1 %v1043_v62  ;;  %1102 = vmatprep.subr.mxu0 %v1034_v1 }
 0x13f   : > { %1171 = vmatprep.subr.mxu1 %v1040_v0  ;;  %1103 = vmatpush1.msra.mxu0 %v1033_v3  ;;  %v1058_v56 = vrot.slane %v1053_v55, %v1057_v51  ;;  %v1066_v57 = vrot.slane %v1053_v55, %v1065_v52  ;;  %v1062_v58 = vrot.slane %v1053_v55, %v1061_v53  ;;  %v3780_v51 = vld [vmem:[#allocation14 + $0x78] sm:$0xff] }
 0x140   : > { %1172 = vmatpush1.msra.mxu1 %v1039_v2  ;;  %1104 = vmatprep.subr.mxu0 %v1030_v5  ;;  %v1070_v59 = vrot.slane %v1053_v55, %v1069_v54 }
 0x141   : > { %1173 = vmatprep.subr.mxu1 %v1036_v4  ;;  %1105 = vmatpush1.msra.mxu0 %v1029_v7 }
 0x142   : > { %1174 = vmatpush1.msra.mxu1 %v1035_v6  ;;  %1106 = vmatprep.subr.mxu0 %v1026_v9  ;;  %v3292_v6 = vmov 1966171168  }
 0x143   : > { %1175 = vmatprep.subr.mxu1 %v1032_v8  ;;  %1107 = vmatpush1.msra.mxu0 %v1025_v11  ;;  %v1325_v7 = vunpack.c.l.s4 %v3292_v6  ;;  %v3828_v6 = vld [vmem:[#allocation14] sm:$0xff] }
 0x144   : > { %1176 = vmatpush1.msra.mxu1 %v1031_v10  ;;  %1108 = vmatprep.subr.mxu0 %v1022_v13 }
 0x145   : > { %1177 = vmatprep.subr.mxu1 %v1028_v12  ;;  %1109 = vmatpush1.msra.mxu0 %v1021_v15  ;;  %v1326_v8 = vunpack.c.0.s8 %v1325_v7 }
 0x146   : > { %1178 = vmatpush1.msra.mxu1 %v1027_v14  ;;  %1266 = vmatprep.subr.mxu0 %v3654_v19 }
 0x147   : > { %1179 = vmatprep.subr.mxu1 %v1024_v17  ;;  %v3748_v10 = vsub.s32 %v1326_v8, %v1056_v50 }
 0x148   : > { %1180 = vmatpush1.msra.mxu1 %v1023_v18 }
 0x149   : > { %1391 = vmatprep.subr.mxu1 %v3654_v19 }
 0x1f1   : > { %v849_v20 = vpop.f32.mrf.mxu1 }
 0x1f2   : > { %v922_v21 = vpop.f32.mrf.mxu0 }
 0x1f3   : > { %v2887_v22 = vpop.f32.mrf.mxu1  ;;  %v923_v24 = vadd.f32 %v922_v21, %v849_v20 }
 0x1f4   : > { %v2898_v23 = vpop.f32.mrf.mxu0 }
 0x1f9   : > { %v1001_v25 = vpop.f32.mrf.mxu1 }
 0x1fa   : > { %v1005_v27 = vadd.f32 %v1001_v25, %v923_v24 }
 0x1fb   : > { %v2909_v28 = vpop.f32.mrf.mxu1 }
 0x1fc   : > { %v1013_v29 = vadd.f32 %v2759_v26, %v1005_v27 }
 0x1fe   : > { %v1014_v30 = vmax.f32 %v1013_v29, 0.0 }
 0x200   : > { %1016 = vst.msk [vmem:[#allocation4] sm:$0xff] %vm1015_vm4, %v1014_v30 }
 0x207   : > { %v1017_v31 = vld [vmem:[#allocation4] ss:$2 sm:$0xf]  ;;  %v1019_v32 = vld [vmem:[#allocation4 + $0x1] ss:$2 sm:$0xf] }
 0x208   : > { %v1020_v33 = vmax.f32 %v1017_v31, %v1019_v32 }
 0x20a   : > { %2760 = vmatmul.mubr.msk.f32.vlgmr.msra.gmra.mxu0 %vm1015_vm4, %v1020_v33  ;;  %2761 = vmatmul.mubr.msk.f32.vlgmr.msra.gmra.mxu1 %vm1015_vm4, %v1020_v33 }
 0x20b   : > { %1267 = vmatpush1.msra.mxu0 %v3662_v34  ;;  %1314 = vmatprep.mubr.f32.mxu0 %v3290_v16 }
 0x20c   : > { %1268 = vmatprep.subr.mxu0 %v3664_v35  ;;  %1392 = vmatpush1.msra.mxu1 %v3662_v34 }
 0x20d   : > { %1269 = vmatpush1.msra.mxu0 %v3668_v36  ;;  %1393 = vmatprep.subr.mxu1 %v3664_v35 }
 0x20e   : > { %1270 = vmatprep.subr.mxu0 %v3671_v37  ;;  %1394 = vmatpush1.msra.mxu1 %v3668_v36 }
 0x20f   : > { %1271 = vmatpush1.msra.mxu0 %v3675_v38  ;;  %1395 = vmatprep.subr.mxu1 %v3671_v37 }
 0x210   : > { %1272 = vmatprep.subr.mxu0 %v3679_v39  ;;  %1396 = vmatpush1.msra.mxu1 %v3675_v38 }
 0x211   : > { %1273 = vmatpush1.msra.mxu0 %v3683_v40  ;;  %1397 = vmatprep.subr.mxu1 %v3679_v39 }
 0x212   : > { %1274 = vmatprep.subr.mxu0 %v3687_v41  ;;  %1398 = vmatpush1.msra.mxu1 %v3683_v40 }
 0x213   : > { %1275 = vmatpush1.msra.mxu0 %v3691_v42  ;;  %1399 = vmatprep.subr.mxu1 %v3687_v41 }
 0x214   : > { %1276 = vmatprep.subr.mxu0 %v3695_v43  ;;  %1400 = vmatpush1.msra.mxu1 %v3691_v42 }
 0x215   : > { %1277 = vmatpush1.msra.mxu0 %v3699_v44  ;;  %1401 = vmatprep.subr.mxu1 %v3695_v43 }
 0x216   : > { %1278 = vmatprep.subr.mxu0 %v3703_v45  ;;  %1402 = vmatpush1.msra.mxu1 %v3699_v44 }
 0x217   : > { %1279 = vmatpush1.msra.mxu0 %v3707_v46  ;;  %1403 = vmatprep.subr.mxu1 %v3703_v45 }
 0x218   : > { %1280 = vmatprep.subr.mxu0 %v3711_v47  ;;  %1404 = vmatpush1.msra.mxu1 %v3707_v46 }
 0x219   : > { %1281 = vmatpush1.msra.mxu0 %v3715_v48  ;;  %1405 = vmatprep.subr.mxu1 %v3711_v47 }
 0x21a   : > { %1315 = vmatmul.mubr.f32.vlgmr.msra.gmra.mxu0 %v3290_v16  ;;  %1406 = vmatpush1.msra.mxu1 %v3715_v48 }
 0x21b   : > { %1439 = vmatprep.mubr.f32.mxu1 %v3290_v16  ;;  %1515 = vmatprep.subr.mxu0 %v3654_v19 }
 0x21c   : > { %1516 = vmatpush1.msra.mxu0 %v3662_v34  ;;  %1563 = vmatprep.mubr.f32.mxu0 %v3290_v16 }
 0x21d   : > { %1517 = vmatprep.subr.mxu0 %v3664_v35  ;;  %1639 = vmatprep.subr.mxu1 %v3654_v19 }
 0x21e   : > { %1518 = vmatpush1.msra.mxu0 %v3668_v36 }
 0x21f   : > { %1519 = vmatprep.subr.mxu0 %v3671_v37 }
 0x220   : > { %1520 = vmatpush1.msra.mxu0 %v3675_v38 }
 0x221   : > { %1521 = vmatprep.subr.mxu0 %v3679_v39 }
 0x222   : > { %1522 = vmatpush1.msra.mxu0 %v3683_v40 }
 0x223   : > { %1523 = vmatprep.subr.mxu0 %v3687_v41 }
 0x224   : > { %1524 = vmatpush1.msra.mxu0 %v3691_v42 }
 0x225   : > { %1525 = vmatprep.subr.mxu0 %v3695_v43 }
 0x226   : > { %1526 = vmatpush1.msra.mxu0 %v3699_v44 }
 0x227   : > { %1527 = vmatprep.subr.mxu0 %v3703_v45 }
 0x228   : > { %1528 = vmatpush1.msra.mxu0 %v3707_v46 }
 0x229   : > { %1529 = vmatprep.subr.mxu0 %v3711_v47 }
 0x22a   : > { %1530 = vmatpush1.msra.mxu0 %v3715_v48 }
 0x22b   : > { %1776 = vmatprep.subr.mxu0 %v3780_v51 }
 0x2ca   : > { %v1144_v60 = vpop.f32.mrf.mxu0  ;;  %v1215_v61 = vpop.f32.mrf.mxu1 }
 0x2cb   : > { %v1145_v0 = vadd.f32 %v1144_v60, %v1058_v56  ;;  %v1216_v1 = vadd.f32 %v1215_v61, %v1066_v57  ;;  %v3785_v56 = vld [vmem:[#allocation14 + $0x70] sm:$0xff]  ;;  %v3787_v57 = vld [vmem:[#allocation14 + $0x68] sm:$0xff] }
 0x2cc   : > { %v1146_v62 = vpop.f32.mrf.mxu0  ;;  %v1217_v63 = vpop.f32.mrf.mxu1  ;;  %v3798_v60 = vld [vmem:[#allocation14 + $0x50] sm:$0xff]  ;;  %v3801_v61 = vld [vmem:[#allocation14 + $0x48] sm:$0xff] }
 0x2cd   : > { %v1147_v2 = vadd.f32 %v1146_v62, %v1062_v58  ;;  %v1218_v3 = vadd.f32 %v1217_v63, %v1070_v59  ;;  %v3791_v58 = vld [vmem:[#allocation14 + $0x60] sm:$0xff]  ;;  %v3794_v59 = vld [vmem:[#allocation14 + $0x58] sm:$0xff] }
 0x2ce   : > { %v3804_v62 = vld [vmem:[#allocation14 + $0x40] sm:$0xff]  ;;  %v3807_v63 = vld [vmem:[#allocation14 + $0x38] sm:$0xff] }
 0x2cf   : > { %v1224_v4 = vcombine.low %v1145_v0, %v1147_v2  ;;  %v1225_v5 = vcombine.low %v1216_v1, %v1218_v3  ;;  %v3810_v0 = vld [vmem:[#allocation14 + $0x30] sm:$0xff]  ;;  %v3813_v1 = vld [vmem:[#allocation14 + $0x28] sm:$0xff]  ;;  %v3816_v2 = vld [vmem:[#allocation14 + $0x20] sm:$0xff] }
 0x2d0   : > { %v3819_v3 = vld [vmem:[#allocation14 + $0x18] sm:$0xff] }
 0x2d1   : > { %1228 = vst [vmem:[#allocation5] sm:$0xff] %v1224_v4  ;;  %1229 = vst [vmem:[#allocation5 + $0x8] sm:$0xff] %v1225_v5  ;;  %v3822_v4 = vld [vmem:[#allocation14 + $0x10] sm:$0xff]  ;;  %v3825_v5 = vld [vmem:[#allocation14 + $0x8] sm:$0xff] }
 0x2d8   : > { %v1246_v15 = vld [vmem:[#allocation5] ss:$4 sm:$0x3] }
 0x2da   : > { %v1316_v9 = vpop.f32.mrf.mxu0 }
 0x2dc   : > { %v1318_v11 = vpop.f32.mrf.mxu0 }
 0x2dd   : > { %v1323_v12 = vcombine.low %v1316_v9, %v1318_v11 }
 0x2df   : > { %v1330_v13 = vrot.slane %v1323_v12, %v3748_v10 }
 0x2e1   : > { %v1337_v14 = vrot.slane %v1330_v13, %v3748_v10  ;;  %v1495_v13 = vld [vmem:[#allocation5 + $0x2] ss:$4 sm:$0x3] }
 0x2e3   : > { %v1339_v17 = vadd.f32 %v1337_v14, %v1246_v15 }
 0x2e5   : > { %1347 = vrot.lane.b32.xlu0 %v1339_v17, %s3293_s23  ;;  %v2762_v18 = vmul.f32 -1.442695, %v1339_v17 }
 0x2e7   : > { %3067 = vpow2.f32 %v2762_v18 }
 0x2f4   : > { %v3068_v19 = vpop.eup %3067 }
 0x2f5   : > { %v1343_v20 = vadd.f32 1.0, %v3068_v19 }
 0x2f7   : > { %3069 = vrcp.f32 %v1343_v20 }
 0x304   : > { %v3070_v23 = vpop.eup %3069 }
 0x305   : > { %v1352_v26 = vmul.f32 0.0, %v3070_v23  ;;  %v1361_v30 = vrot.slane %v3070_v23, 1 }
 0x357   : > { %v1348_v21 = vpop.permute.xlu0 %1347 }
 0x358   : > { %v1349_v22 = vrot.slane %v1348_v21, 1  ;;  %v1759_v21 = vld [vmem:[#allocation5 + $0xb] ss:$4 sm:$0x3] }
 0x35a   : > { %3071 = vtanh.f32 %v1349_v22 }
 0x367   : > { %v3072_v24 = vpop.eup %3071 }
 0x368   : > { %v1353_v25 = vmul.f32 %v3072_v24, %v3070_v23 }
 0x36a   : > { %1355 = vrot.lane.b32.xlu0 %v1353_v25, %s3293_s23 }
 0x3dc   : > { %v1356_v27 = vpop.permute.xlu0 %1355 }
 0x3dd   : > { %v1358_v28 = vadd.f32 %v1356_v27, %v1352_v26 }
 0x3df   : > { %3073 = vtanh.f32 %v1358_v28 }
 0x3ec   : > { %v3074_v29 = vpop.eup %3073 }
 0x3ed   : > { %1364 = vrot.lane.b32.xlu1 %v3074_v29, %s3293_s23 }
 0x45f   : > { %v1365_v31 = vpop.permute.xlu1 %1364 }
 0x460   : > { %v1367_v32 = vmul.f32 %v1365_v31, %v1361_v30 }
 0x462   : > { %1369 = vst.msk [vmem:[#allocation6] sm:$0x1] %vm1368_vm5, %v1367_v32  ;;  %2763 = vmatmul.mubr.msk.f32.vlgmr.msra.gmra.mxu1 %vm1015_vm4, %v1367_v32 }
 0x463   : > { %1640 = vmatpush1.msra.mxu1 %v3662_v34  ;;  %1687 = vmatprep.mubr.f32.mxu1 %v3290_v16 }
 0x464   : > { %1641 = vmatprep.subr.mxu1 %v3664_v35 }
 0x465   : > { %1642 = vmatpush1.msra.mxu1 %v3668_v36 }
 0x466   : > { %1643 = vmatprep.subr.mxu1 %v3671_v37 }
 0x467   : > { %1644 = vmatpush1.msra.mxu1 %v3675_v38  ;;  %v1371_v38 = vld [vmem:[#allocation5 + $0x1] ss:$4 sm:$0x3] }
 0x468   : > { %1645 = vmatprep.subr.mxu1 %v3679_v39 }
 0x469   : > { %1646 = vmatpush1.msra.mxu1 %v3683_v40 }
 0x46a   : > { %1647 = vmatprep.subr.mxu1 %v3687_v41 }
 0x46b   : > { %1648 = vmatpush1.msra.mxu1 %v3691_v42 }
 0x46c   : > { %1649 = vmatprep.subr.mxu1 %v3695_v43 }
 0x46d   : > { %1650 = vmatpush1.msra.mxu1 %v3699_v44 }
 0x46e   : > { %1651 = vmatprep.subr.mxu1 %v3703_v45 }
 0x46f   : > { %1652 = vmatpush1.msra.mxu1 %v3707_v46 }
 0x470   : > { %1653 = vmatprep.subr.mxu1 %v3711_v47 }
 0x471   : > { %1654 = vmatpush1.msra.mxu1 %v3715_v48 }
 0x472   : > { %1900 = vmatprep.subr.mxu1 %v3780_v51 }
 0x522   : > { %v1441_v33 = vpop.f32.mrf.mxu1 }
 0x524   : > { %v1443_v34 = vpop.f32.mrf.mxu1 }
 0x525   : > { %v1448_v35 = vcombine.low %v1441_v33, %v1443_v34 }
 0x527   : > { %v1455_v36 = vrot.slane %v1448_v35, %v3748_v10 }
 0x529   : > { %v1462_v37 = vrot.slane %v1455_v36, %v3748_v10 }
 0x52b   : > { %v1464_v39 = vadd.f32 %v1462_v37, %v1371_v38 }
 0x52d   : > { %1472 = vrot.lane.b32.xlu1 %v1464_v39, %s3293_s23  ;;  %v2764_v40 = vmul.f32 -1.442695, %v1464_v39 }
 0x52f   : > { %3075 = vpow2.f32 %v2764_v40 }
 0x53c   : > { %v3076_v41 = vpop.eup %3075 }
 0x53d   : > { %v1468_v42 = vadd.f32 1.0, %v3076_v41 }
 0x53f   : > { %3077 = vrcp.f32 %v1468_v42 }
 0x54c   : > { %v3078_v45 = vpop.eup %3077 }
 0x54d   : > { %v1477_v48 = vmul.f32 %v3078_v45, %v1358_v28  ;;  %v1486_v53 = vrot.slane %v3078_v45, 1 }
 0x59f   : > { %v1473_v43 = vpop.permute.xlu1 %1472 }
 0x5a0   : > { %v1474_v44 = vrot.slane %v1473_v43, 1 }
 0x5a2   : > { %3079 = vtanh.f32 %v1474_v44 }
 0x5af   : > { %v3080_v46 = vpop.eup %3079 }
 0x5b0   : > { %v1478_v47 = vmul.f32 %v3080_v46, %v3078_v45 }
 0x5b2   : > { %1480 = vrot.lane.b32.xlu0 %v1478_v47, %s3293_s23 }
 0x624   : > { %v1481_v49 = vpop.permute.xlu0 %1480 }
 0x625   : > { %v3777_v50 = vadd.f32 %v1481_v49, %v1477_v48 }
 0x627   : > { %3081 = vtanh.f32 %v3777_v50 }
 0x634   : > { %v3082_v52 = vpop.eup %3081 }
 0x635   : > { %1489 = vrot.lane.b32.xlu1 %v3082_v52, %s3293_s23 }
 0x6a7   : > { %v1490_v54 = vpop.permute.xlu1 %1489 }
 0x6a8   : > { %v1492_v55 = vmul.f32 %v1490_v54, %v1486_v53 }
 0x6aa   : > { %1493 = vst.msk [vmem:[#allocation6 + $0x1] sm:$0x1] %vm1368_vm5, %v1492_v55  ;;  %2765 = vmatmul.mubr.msk.f32.vlgmr.msra.gmra.mxu0 %vm1015_vm4, %v1492_v55 }
 0x6ab   : > { %1777 = vmatpush1.msra.mxu0 %v3785_v56  ;;  %1824 = vmatprep.mubr.f32.mxu0 %v3290_v16 }
 0x6ac   : > { %1778 = vmatprep.subr.mxu0 %v3787_v57 }
 0x6ad   : > { %1779 = vmatpush1.msra.mxu0 %v3791_v58 }
 0x6ae   : > { %1780 = vmatprep.subr.mxu0 %v3794_v59 }
 0x6af   : > { %1781 = vmatpush1.msra.mxu0 %v3798_v60 }
 0x6b0   : > { %1782 = vmatprep.subr.mxu0 %v3801_v61 }
 0x6b1   : > { %1783 = vmatpush1.msra.mxu0 %v3804_v62 }
 0x6b2   : > { %1784 = vmatprep.subr.mxu0 %v3807_v63 }
 0x6b3   : > { %1785 = vmatpush1.msra.mxu0 %v3810_v0 }
 0x6b4   : > { %1786 = vmatprep.subr.mxu0 %v3813_v1 }
 0x6b5   : > { %1787 = vmatpush1.msra.mxu0 %v3816_v2 }
 0x6b6   : > { %1788 = vmatprep.subr.mxu0 %v3819_v3 }
 0x6b7   : > { %1789 = vmatpush1.msra.mxu0 %v3822_v4 }
 0x6b8   : > { %1790 = vmatprep.subr.mxu0 %v3825_v5 }
 0x6b9   : > { %1791 = vmatpush1.msra.mxu0 %v3828_v6 }
 0x6ba   : > { %1825 = vmatmul.mubr.f32.vlgmr.msra.gmra.mxu0 %v3290_v16  ;;  %2024 = vmatprep.subr.mxu0 %v3780_v51 }
 0x6bb   : > { %2025 = vmatpush1.msra.mxu0 %v3785_v56  ;;  %2072 = vmatprep.mubr.f32.mxu0 %v3290_v16 }
 0x6bc   : > { %2026 = vmatprep.subr.mxu0 %v3787_v57 }
 0x6bd   : > { %2027 = vmatpush1.msra.mxu0 %v3791_v58 }
 0x6be   : > { %2028 = vmatprep.subr.mxu0 %v3794_v59 }
 0x6bf   : > { %2029 = vmatpush1.msra.mxu0 %v3798_v60 }
 0x6c0   : > { %2030 = vmatprep.subr.mxu0 %v3801_v61 }
 0x6c1   : > { %2031 = vmatpush1.msra.mxu0 %v3804_v62 }
 0x6c2   : > { %2032 = vmatprep.subr.mxu0 %v3807_v63 }
 0x6c3   : > { %2033 = vmatpush1.msra.mxu0 %v3810_v0 }
 0x6c4   : > { %2034 = vmatprep.subr.mxu0 %v3813_v1 }
 0x6c5   : > { %2035 = vmatpush1.msra.mxu0 %v3816_v2 }
 0x6c6   : > { %2036 = vmatprep.subr.mxu0 %v3819_v3 }
 0x6c7   : > { %2037 = vmatpush1.msra.mxu0 %v3822_v4 }
 0x6c8   : > { %2038 = vmatprep.subr.mxu0 %v3825_v5 }
 0x6c9   : > { %2039 = vmatpush1.msra.mxu0 %v3828_v6 }
 0x6ca   : > { %2910 = vmatprep.subr.mxu0 %v3290_v16 }
 0x76a   : > { %v1565_v7 = vpop.f32.mrf.mxu0 }
 0x76c   : > { %v1567_v8 = vpop.f32.mrf.mxu0 }
 0x76d   : > { %v1572_v9 = vcombine.low %v1565_v7, %v1567_v8 }
 0x76f   : > { %v1579_v11 = vrot.slane %v1572_v9, %v3748_v10 }
 0x771   : > { %v1586_v12 = vrot.slane %v1579_v11, %v3748_v10 }
 0x773   : > { %v1588_v14 = vadd.f32 %v1586_v12, %v1495_v13 }
 0x775   : > { %1596 = vrot.lane.b32.xlu0 %v1588_v14, %s3293_s23  ;;  %v2766_v23 = vmul.f32 -1.442695, %v1588_v14 }
 0x777   : > { %3083 = vpow2.f32 %v2766_v23 }
 0x77a   : > { %v1826_v15 = vpop.f32.mrf.mxu0 }
 0x77c   : > { %v1828_v17 = vpop.f32.mrf.mxu0 }
 0x77d   : > { %v1833_v18 = vcombine.low %v1826_v15, %v1828_v17 }
 0x77f   : > { %v1840_v19 = vrot.slane %v1833_v18, %v3748_v10 }
 0x781   : > { %v1847_v20 = vrot.slane %v1840_v19, %v3748_v10 }
 0x783   : > { %v1849_v22 = vadd.f32 %v1847_v20, %v1759_v21  ;;  %v2004_v21 = vld [vmem:[#allocation5 + $0x9] ss:$4 sm:$0x3] }
 0x784   : > { %v3084_v25 = vpop.eup %3083 }
 0x785   : > { %1857 = vrot.lane.b32.xlu1 %v1849_v22, %s3293_s23  ;;  %v2769_v24 = vmul.f32 -1.442695, %v1849_v22  ;;  %v1592_v26 = vadd.f32 1.0, %v3084_v25 }
 0x787   : > { %3085 = vpow2.f32 %v2769_v24 }
 0x788   : > { %3087 = vrcp.f32 %v1592_v26 }
 0x794   : > { %v3086_v29 = vpop.eup %3085 }
 0x795   : > { %v1853_v30 = vadd.f32 1.0, %v3086_v29  ;;  %v3088_v31 = vpop.eup %3087 }
 0x796   : > { %v1601_v39 = vmul.f32 %v3088_v31, %v3777_v50  ;;  %v1610_v47 = vrot.slane %v3088_v31, 1 }
 0x7e7   : > { %v1597_v27 = vpop.permute.xlu0 %1596 }
 0x7e8   : > { %v1598_v28 = vrot.slane %v1597_v27, 1 }
 0x7ea   : > { %3089 = vtanh.f32 %v1598_v28 }
 0x7eb   : > { %3091 = vrcp.f32 %v1853_v30 }
 0x7f7   : > { %v3090_v32 = vpop.eup %3089  ;;  %v1858_v33 = vpop.permute.xlu1 %1857 }
 0x7f8   : > { %v1859_v34 = vrot.slane %v1858_v33, 1  ;;  %v1602_v35 = vmul.f32 %v3090_v32, %v3088_v31  ;;  %v3092_v36 = vpop.eup %3091  ;;  %v1619_v33 = vld [vmem:[#allocation5 + $0x3] ss:$4 sm:$0x3] }
 0x7f9   : > { %v1862_v42 = vmul.f32 0.0, %v3092_v36  ;;  %v1871_v50 = vrot.slane %v3092_v36, 1 }
 0x7fa   : > { %3093 = vtanh.f32 %v1859_v34  ;;  %1604 = vrot.lane.b32.xlu0 %v1602_v35, %s3293_s23 }
 0x807   : > { %v3094_v37 = vpop.eup %3093 }
 0x808   : > { %v1863_v38 = vmul.f32 %v3094_v37, %v3092_v36 }
 0x80a   : > { %1865 = vrot.lane.b32.xlu1 %v1863_v38, %s3293_s23 }
 0x86c   : > { %v1605_v40 = vpop.permute.xlu0 %1604 }
 0x86d   : > { %v3861_v41 = vadd.f32 %v1605_v40, %v1601_v39 }
 0x86f   : > { %3095 = vtanh.f32 %v3861_v41 }
 0x87c   : > { %v3096_v43 = vpop.eup %3095  ;;  %v1866_v44 = vpop.permute.xlu1 %1865 }
 0x87d   : > { %v3864_v45 = vadd.f32 %v1866_v44, %v1862_v42  ;;  %1613 = vrot.lane.b32.xlu0 %v3096_v43, %s3293_s23 }
 0x87f   : > { %3097 = vtanh.f32 %v3864_v45 }
 0x88c   : > { %v3098_v46 = vpop.eup %3097 }
 0x88d   : > { %1874 = vrot.lane.b32.xlu1 %v3098_v46, %s3293_s23 }
 0x8ef   : > { %v1614_v48 = vpop.permute.xlu0 %1613 }
 0x8f0   : > { %v1616_v49 = vmul.f32 %v1614_v48, %v1610_v47 }
 0x8f2   : > { %1617 = vst.msk [vmem:[#allocation6 + $0x2] sm:$0x1] %vm1368_vm5, %v1616_v49  ;;  %2767 = vmatmul.mubr.msk.f32.vlgmr.msra.gmra.mxu1 %vm1015_vm4, %v1616_v49 }
 0x8f3   : > { %1901 = vmatpush1.msra.mxu1 %v3785_v56  ;;  %1948 = vmatprep.mubr.f32.mxu1 %v3290_v16 }
 0x8f4   : > { %1902 = vmatprep.subr.mxu1 %v3787_v57 }
 0x8f5   : > { %1903 = vmatpush1.msra.mxu1 %v3791_v58 }
 0x8f6   : > { %1904 = vmatprep.subr.mxu1 %v3794_v59 }
 0x8f7   : > { %1905 = vmatpush1.msra.mxu1 %v3798_v60 }
 0x8f8   : > { %1906 = vmatprep.subr.mxu1 %v3801_v61 }
 0x8f9   : > { %1907 = vmatpush1.msra.mxu1 %v3804_v62 }
 0x8fa   : > { %1908 = vmatprep.subr.mxu1 %v3807_v63 }
 0x8fb   : > { %1909 = vmatpush1.msra.mxu1 %v3810_v0 }
 0x8fc   : > { %1910 = vmatprep.subr.mxu1 %v3813_v1 }
 0x8fd   : > { %1911 = vmatpush1.msra.mxu1 %v3816_v2 }
 0x8fe   : > { %1912 = vmatprep.subr.mxu1 %v3819_v3 }
 0x8ff   : > { %v1875_v52 = vpop.permute.xlu1 %1874  ;;  %1913 = vmatpush1.msra.mxu1 %v3822_v4 }
 0x900   : > { %v1877_v53 = vmul.f32 %v1875_v52, %v1871_v50  ;;  %1914 = vmatprep.subr.mxu1 %v3825_v5  ;;  %v2260_v52 = vld [vmem:[%s4131_s9 + $0x38] sm:$0xff] }
 0x901   : > { %1915 = vmatpush1.msra.mxu1 %v3828_v6 }
 0x902   : > { %1878 = vst.msk [vmem:[#allocation7 + $0x3] sm:$0x1] %vm1368_vm5, %v1877_v53  ;;  %2770 = vmatmul.mubr.msk.f32.vlgmr.msra.gmra.mxu1 %vm1015_vm4, %v1877_v53  ;;  %2148 = vmatprep.subr.mxu1 %v3780_v51  ;;  %v2259_v53 = vld [vmem:[%s4131_s9 + $0x30] sm:$0xff] }
 0x903   : > { %2149 = vmatpush1.msra.mxu1 %v3785_v56  ;;  %2196 = vmatprep.mubr.f32.mxu1 %v3290_v16 }
 0x904   : > { %2150 = vmatprep.subr.mxu1 %v3787_v57 }
 0x905   : > { %2151 = vmatpush1.msra.mxu1 %v3791_v58 }
 0x906   : > { %2152 = vmatprep.subr.mxu1 %v3794_v59 }
 0x907   : > { %2153 = vmatpush1.msra.mxu1 %v3798_v60 }
 0x908   : > { %2154 = vmatprep.subr.mxu1 %v3801_v61  ;;  %v1880_v61 = vld [vmem:[#allocation5 + $0xa] ss:$4 sm:$0x3] }
 0x909   : > { %2155 = vmatpush1.msra.mxu1 %v3804_v62 }
 0x90a   : > { %2156 = vmatprep.subr.mxu1 %v3807_v63 }
 0x90b   : > { %2157 = vmatpush1.msra.mxu1 %v3810_v0 }
 0x90c   : > { %2158 = vmatprep.subr.mxu1 %v3813_v1 }
 0x90d   : > { %2159 = vmatpush1.msra.mxu1 %v3816_v2 }
 0x90e   : > { %2160 = vmatprep.subr.mxu1 %v3819_v3 }
 0x90f   : > { %2161 = vmatpush1.msra.mxu1 %v3822_v4 }
 0x910   : > { %2162 = vmatprep.subr.mxu1 %v3825_v5 }
 0x911   : > { %2163 = vmatpush1.msra.mxu1 %v3828_v6 }
 0x912   : > { %2929 = vmatprep.subr.mxu1 %v3290_v16 }
 0x9b2   : > { %v1689_v51 = vpop.f32.mrf.mxu1 }
 0x9b4   : > { %v1691_v54 = vpop.f32.mrf.mxu1 }
 0x9b5   : > { %v1696_v55 = vcombine.low %v1689_v51, %v1691_v54  ;;  %v2258_v54 = vld [vmem:[%s4131_s9 + $0x28] sm:$0xff] }
 0x9b7   : > { %v1703_v28 = vrot.slane %v1696_v55, %v3748_v10 }
 0x9b9   : > { %v1710_v31 = vrot.slane %v1703_v28, %v3748_v10  ;;  %v2263_v28 = vld [vmem:[%s4131_s9 + $0x50] sm:$0xff] }
 0x9bb   : > { %v1712_v34 = vadd.f32 %v1710_v31, %v1619_v33 }
 0x9bd   : > { %v2768_v35 = vmul.f32 -1.442695, %v1712_v34 }
 0x9c2   : > { %v1950_v56 = vpop.f32.mrf.mxu1 }
 0x9c4   : > { %v1952_v57 = vpop.f32.mrf.mxu1 }
 0x9c5   : > { %v1957_v58 = vcombine.low %v1950_v56, %v1952_v57  ;;  %v2257_v57 = vld [vmem:[%s4131_s9 + $0x20] sm:$0xff] }
 0x9c7   : > { %v1964_v59 = vrot.slane %v1957_v58, %v3748_v10  ;;  %v2255_v58 = vld [vmem:[%s4131_s9 + $0x10] sm:$0xff] }
 0x9c9   : > { %v1971_v60 = vrot.slane %v1964_v59, %v3748_v10  ;;  %v2254_v59 = vld [vmem:[%s4131_s9 + $0x8] sm:$0xff] }
 0x9cb   : > { %v1973_v62 = vadd.f32 %v1971_v60, %v1880_v61  ;;  %v2253_v60 = vld [vmem:[%s4131_s9] sm:$0xff] }
 0x9cd   : > { %1981 = vrot.lane.b32.xlu0 %v1973_v62, %s3293_s23  ;;  %v2771_v63 = vmul.f32 -1.442695, %v1973_v62 }
 0x9cf   : > { %3099 = vpow2.f32 %v2771_v63 }
 0x9dc   : > { %v3100_v0 = vpop.eup %3099 }
 0x9dd   : > { %v1977_v1 = vadd.f32 1.0, %v3100_v0 }
 0x9df   : > { %3101 = vrcp.f32 %v1977_v1 }
 0x9ec   : > { %v3102_v4 = vpop.eup %3101 }
 0x9ed   : > { %v1986_v7 = vmul.f32 %v3102_v4, %v3864_v45  ;;  %v1995_v12 = vrot.slane %v3102_v4, 1 }
 0xa3f   : > { %v1982_v2 = vpop.permute.xlu0 %1981 }
 0xa40   : > { %v1983_v3 = vrot.slane %v1982_v2, 1 }
 0xa42   : > { %3103 = vtanh.f32 %v1983_v3 }
 0xa4f   : > { %v3104_v5 = vpop.eup %3103 }
 0xa50   : > { %v1987_v6 = vmul.f32 %v3104_v5, %v3102_v4 }
 0xa52   : > { %1989 = vrot.lane.b32.xlu1 %v1987_v6, %s3293_s23 }
 0xac4   : > { %v1990_v8 = vpop.permute.xlu1 %1989 }
 0xac5   : > { %v1992_v9 = vadd.f32 %v1990_v8, %v1986_v7  ;;  %v2128_v7 = vld [vmem:[#allocation5 + $0x8] ss:$4 sm:$0x3] }
 0xac7   : > { %3105 = vtanh.f32 %v1992_v9 }
 0xad4   : > { %v3106_v11 = vpop.eup %3105 }
 0xad5   : > { %1998 = vrot.lane.b32.xlu0 %v3106_v11, %s3293_s23 }
 0xb47   : > { %v1999_v13 = vpop.permute.xlu0 %1998 }
 0xb48   : > { %v2001_v14 = vmul.f32 %v1999_v13, %v1995_v12 }
 0xb4a   : > { %2002 = vst.msk [vmem:[#allocation7 + $0x2] sm:$0x1] %vm1368_vm5, %v2001_v14  ;;  %2772 = vmatmul.mubr.msk.f32.vlgmr.msra.gmra.mxu0 %vm1015_vm4, %v2001_v14 }
 0xb4b   : > { %2926 = vmatprep.mubr.msk.f32.mxu0 %vm3291_vm2, %v3290_v16 }
 0xc0a   : > { %v2074_v15 = vpop.f32.mrf.mxu0 }
 0xc0c   : > { %v2076_v17 = vpop.f32.mrf.mxu0 }
 0xc0d   : > { %v2081_v18 = vcombine.low %v2074_v15, %v2076_v17 }
 0xc0f   : > { %v2088_v19 = vrot.slane %v2081_v18, %v3748_v10 }
 0xc11   : > { %v2095_v20 = vrot.slane %v2088_v19, %v3748_v10 }
 0xc13   : > { %v2097_v22 = vadd.f32 %v2095_v20, %v2004_v21  ;;  %v2267_v21 = vld [vmem:[%s4131_s9 + $0x70] sm:$0xff] }
 0xc15   : > { %2105 = vrot.lane.b32.xlu1 %v2097_v22, %s3293_s23  ;;  %v2773_v23 = vmul.f32 -1.442695, %v2097_v22  ;;  %v2266_v22 = vld [vmem:[%s4131_s9 + $0x68] sm:$0xff] }
 0xc17   : > { %3107 = vpow2.f32 %v2773_v23 }
 0xc24   : > { %v3108_v24 = vpop.eup %3107 }
 0xc25   : > { %v2101_v25 = vadd.f32 1.0, %v3108_v24 }
 0xc27   : > { %3109 = vrcp.f32 %v2101_v25 }
 0xc34   : > { %v3110_v29 = vpop.eup %3109 }
 0xc35   : > { %v2110_v37 = vmul.f32 %v3110_v29, %v1992_v9  ;;  %v2119_v48 = vrot.slane %v3110_v29, 1 }
 0xc87   : > { %v2106_v26 = vpop.permute.xlu1 %2105 }
 0xc88   : > { %v2107_v27 = vrot.slane %v2106_v26, 1  ;;  %v2265_v26 = vld [vmem:[%s4131_s9 + $0x60] sm:$0xff] }
 0xc8a   : > { %3111 = vtanh.f32 %v2107_v27  ;;  %v2264_v27 = vld [vmem:[%s4131_s9 + $0x58] sm:$0xff] }
 0xc8b   : > { %3113 = vpow2.f32 %v2768_v35 }
 0xc97   : > { %v3112_v30 = vpop.eup %3111 }
 0xc98   : > { %v2111_v32 = vmul.f32 %v3112_v30, %v3110_v29  ;;  %v3114_v36 = vpop.eup %3113  ;;  %v2262_v29 = vld [vmem:[%s4131_s9 + $0x48] sm:$0xff]  ;;  %v2261_v30 = vld [vmem:[%s4131_s9 + $0x40] sm:$0xff] }
 0xc99   : > { %v1716_v40 = vadd.f32 1.0, %v3114_v36  ;;  %v3294_v36 = vmov 0  }
 0xc9a   : > { %2113 = vrot.lane.b32.xlu0 %v2111_v32, %s3293_s23 }
 0xc9b   : > { %3066 = vset.pattern.permute.xlu0 %v3294_v36 }
 0xc9e   : > { %1720 = vrot.lane.b32.xlu0 %v1712_v34, %s3293_s23 }
 0xd0c   : > { %v2114_v38 = vpop.permute.xlu0 %2113 }
 0xd0d   : > { %v3924_v39 = vadd.f32 %v2114_v38, %v2110_v37  ;;  %v2778_v38 = vld [vmem:[#allocation8] ss:$0 sm:$0xff] }
 0xd0f   : > { %3115 = vtanh.f32 %v3924_v39 }
 0xd10   : > { %v1721_v42 = vpop.permute.xlu0 %1720  ;;  %3117 = vrcp.f32 %v1716_v40 }
 0xd11   : > { %v1722_v43 = vrot.slane %v1721_v42, 1 }
 0xd13   : > { %3119 = vtanh.f32 %v1722_v43 }
 0xd1c   : > { %v3116_v44 = vpop.eup %3115 }
 0xd1d   : > { %2122 = vrot.lane.b32.xlu1 %v3116_v44, %s3293_s23  ;;  %v3118_v45 = vpop.eup %3117 }
 0xd1e   : > { %v1725_v51 = vmul.f32 %v3118_v45, %v3861_v41  ;;  %v2256_v41 = vld [vmem:[%s4131_s9 + $0x18] sm:$0xff]  ;;  %v1734_v62 = vrot.slane %v3118_v45, 1 }
 0xd20   : > { %v3120_v46 = vpop.eup %3119 }
 0xd21   : > { %v1726_v47 = vmul.f32 %v3120_v46, %v3118_v45 }
 0xd23   : > { %1728 = vrot.lane.b32.xlu0 %v1726_v47, %s3293_s23 }
 0xd8f   : > { %v2123_v49 = vpop.permute.xlu1 %2122 }
 0xd90   : > { %v2125_v50 = vmul.f32 %v2123_v49, %v2119_v48 }
 0xd92   : > { %2126 = vst.msk [vmem:[#allocation7 + $0x1] sm:$0x1] %vm1368_vm5, %v2125_v50  ;;  %2774 = vmatmul.mubr.msk.f32.vlgmr.msra.gmra.mxu1 %vm1015_vm4, %v2125_v50 }
 0xd93   : > { %2930 = vmatpush3.msra.mxu1 %v2260_v52  ;;  %2945 = vmatprep.mubr.msk.f32.mxu1 %vm3291_vm2, %v3290_v16 }
 0xd94   : > { %2931 = vmatprep.subr.mxu1 %v3290_v16 }
 0xd95   : > { %v1729_v55 = vpop.permute.xlu0 %1728  ;;  %2932 = vmatpush3.msra.mxu1 %v2259_v53 }
 0xd96   : > { %v1731_v56 = vadd.f32 %v1729_v55, %v1725_v51  ;;  %2933 = vmatprep.subr.mxu1 %v3290_v16 }
 0xd97   : > { %2934 = vmatpush3.msra.mxu1 %v2258_v54 }
 0xd98   : > { %3121 = vtanh.f32 %v1731_v56  ;;  %2935 = vmatprep.subr.mxu1 %v3290_v16 }
 0xd99   : > { %2936 = vmatpush3.msra.mxu1 %v2257_v57 }
 0xd9a   : > { %2937 = vmatprep.subr.mxu1 %v3290_v16 }
 0xd9b   : > { %2938 = vmatpush3.msra.mxu1 %v2256_v41 }
 0xd9c   : > { %2939 = vmatprep.subr.mxu1 %v3290_v16 }
 0xd9d   : > { %2940 = vmatpush3.msra.mxu1 %v2255_v58 }
 0xd9e   : > { %2941 = vmatprep.subr.mxu1 %v3290_v16 }
 0xd9f   : > { %2942 = vmatpush3.msra.mxu1 %v2254_v59  ;;  %v2480_v59 = vld [vmem:[%s4133_s11 + $0x78] sm:$0xff] }
 0xda0   : > { %2943 = vmatprep.subr.mxu1 %v3290_v16 }
 0xda1   : > { %2944 = vmatpush3.msra.mxu1 %v2253_v60  ;;  %v2472_v60 = vld [vmem:[%s4133_s11 + $0x38] sm:$0xff] }
 0xda2   : > { %2967 = vmatprep.subr.mxu1 %v3290_v16 }
 0xda5   : > { %v3122_v61 = vpop.eup %3121 }
 0xda6   : > { %1737 = vrot.lane.b32.xlu0 %v3122_v61, %s3293_s23 }
 0xe18   : > { %v1738_v63 = vpop.permute.xlu0 %1737 }
 0xe19   : > { %v1740_v0 = vmul.f32 %v1738_v63, %v1734_v62  ;;  %v2479_v63 = vld [vmem:[%s4133_s11 + $0x70] sm:$0xff] }
 0xe1b   : > { %1741 = vst.msk [vmem:[#allocation6 + $0x3] sm:$0x1] %vm1368_vm5, %v1740_v0  ;;  %v2471_v0 = vld [vmem:[%s4133_s11 + $0x30] sm:$0xff] }
 0xe22   : > { %v3968_v1 = vld [vmem:[#allocation6] sm:$0xf] }
 0xe23   : > { %2946 = vmatmul.mubr.msk.f32.vlgmr.msra.gmra.mxu1 %vm1015_vm4, %v3968_v1 }
 0xe24   : > { %2983 = vmatprep.mubr.msk.f32.mxu1 %vm3291_vm2, %v3290_v16  ;;  %2968 = vmatpush3.msra.mxu1 %v2472_v60 }
 0xe25   : > { %2969 = vmatprep.subr.mxu1 %v3290_v16 }
 0xe26   : > { %2970 = vmatpush3.msra.mxu1 %v2471_v0 }
 0xe27   : > { %2971 = vmatprep.subr.mxu1 %v3290_v16 }
 0xe52   : > { %v2198_v2 = vpop.f32.mrf.mxu1 }
 0xe54   : > { %v2200_v3 = vpop.f32.mrf.mxu1 }
 0xe55   : > { %v2205_v4 = vcombine.low %v2198_v2, %v2200_v3  ;;  %v2478_v2 = vld [vmem:[%s4133_s11 + $0x68] sm:$0xff] }
 0xe56   : > { %v2470_v3 = vld [vmem:[%s4133_s11 + $0x28] sm:$0xff] }
 0xe57   : > { %v2212_v5 = vrot.slane %v2205_v4, %v3748_v10  ;;  %2972 = vmatpush3.msra.mxu1 %v2470_v3  ;;  %v2477_v4 = vld [vmem:[%s4133_s11 + $0x60] sm:$0xff] }
 0xe58   : > { %2973 = vmatprep.subr.mxu1 %v3290_v16 }
 0xe59   : > { %v2219_v6 = vrot.slane %v2212_v5, %v3748_v10  ;;  %v2268_v10 = vld [vmem:[%s4131_s9 + $0x78] sm:$0xff]  ;;  %v2469_v5 = vld [vmem:[%s4133_s11 + $0x20] sm:$0xff] }
 0xe5a   : > { %2911 = vmatpush3.msra.mxu0 %v2268_v10  ;;  %2974 = vmatpush3.msra.mxu1 %v2469_v5 }
 0xe5b   : > { %v2221_v8 = vadd.f32 %v2219_v6, %v2128_v7  ;;  %2912 = vmatprep.subr.mxu0 %v3290_v16  ;;  %v2476_v6 = vld [vmem:[%s4133_s11 + $0x58] sm:$0xff]  ;;  %2975 = vmatprep.subr.mxu1 %v3290_v16 }
 0xe5c   : > { %2913 = vmatpush3.msra.mxu0 %v2267_v21  ;;  %v2468_v7 = vld [vmem:[%s4133_s11 + $0x18] sm:$0xff] }
 0xe5d   : > { %2229 = vrot.lane.b32.xlu1 %v2221_v8, %s3293_s23  ;;  %v2775_v9 = vmul.f32 -1.442695, %v2221_v8  ;;  %2914 = vmatprep.subr.mxu0 %v3290_v16  ;;  %v2475_v8 = vld [vmem:[%s4133_s11 + $0x50] sm:$0xff] }
 0xe5e   : > { %2915 = vmatpush3.msra.mxu0 %v2266_v22  ;;  %2976 = vmatpush3.msra.mxu1 %v2468_v7 }
 0xe5f   : > { %3123 = vpow2.f32 %v2775_v9  ;;  %2916 = vmatprep.subr.mxu0 %v3290_v16  ;;  %v2467_v9 = vld [vmem:[%s4133_s11 + $0x10] sm:$0xff]  ;;  %2977 = vmatprep.subr.mxu1 %v3290_v16 }
 0xe60   : > { %2917 = vmatpush3.msra.mxu0 %v2265_v26  ;;  %2978 = vmatpush3.msra.mxu1 %v2467_v9 }
 0xe61   : > { %2918 = vmatprep.subr.mxu0 %v3290_v16  ;;  %2979 = vmatprep.subr.mxu1 %v3290_v16 }
 0xe62   : > { %2919 = vmatpush3.msra.mxu0 %v2264_v27 }
 0xe63   : > { %2920 = vmatprep.subr.mxu0 %v3290_v16 }
 0xe64   : > { %2921 = vmatpush3.msra.mxu0 %v2263_v28 }
 0xe65   : > { %2922 = vmatprep.subr.mxu0 %v3290_v16 }
 0xe66   : > { %2923 = vmatpush3.msra.mxu0 %v2262_v29 }
 0xe67   : > { %2924 = vmatprep.subr.mxu0 %v3290_v16 }
 0xe68   : > { %2925 = vmatpush3.msra.mxu0 %v2261_v30 }
 0xe69   : > { %2948 = vmatprep.subr.mxu0 %v3290_v16 }
 0xe6c   : > { %v3124_v11 = vpop.eup %3123 }
 0xe6d   : > { %v2225_v12 = vadd.f32 1.0, %v3124_v11  ;;  %v2474_v11 = vld [vmem:[%s4133_s11 + $0x48] sm:$0xff] }
 0xe6f   : > { %3125 = vrcp.f32 %v2225_v12  ;;  %v2466_v12 = vld [vmem:[%s4133_s11 + $0x8] sm:$0xff] }
 0xe70   : > { %2980 = vmatpush3.msra.mxu1 %v2466_v12 }
 0xe71   : > { %2981 = vmatprep.subr.mxu1 %v3290_v16 }
 0xe7c   : > { %v3126_v15 = vpop.eup %3125 }
 0xe7d   : > { %v2234_v23 = vmul.f32 %v3126_v15, %v3924_v39  ;;  %v2243_v32 = vrot.slane %v3126_v15, 1 }
 0xecf   : > { %v2230_v13 = vpop.permute.xlu1 %2229 }
 0xed0   : > { %v2231_v14 = vrot.slane %v2230_v13, 1  ;;  %v2473_v13 = vld [vmem:[%s4133_s11 + $0x40] sm:$0xff] }
 0xed2   : > { %3127 = vtanh.f32 %v2231_v14  ;;  %v2465_v14 = vld [vmem:[%s4133_s11] sm:$0xff] }
 0xed3   : > { %2982 = vmatpush3.msra.mxu1 %v2465_v14 }
 0xedf   : > { %v3128_v17 = vpop.eup %3127 }
 0xee0   : > { %v2235_v18 = vmul.f32 %v3128_v17, %v3126_v15 }
 0xee2   : > { %2237 = vrot.lane.b32.xlu1 %v2235_v18, %s3293_s23 }
 0xee3   : > { %v2411_v19 = vpop.f32.mrf.mxu1 }
 0xee5   : > { %v2947_v20 = vpop.f32.mrf.mxu1 }
 0xf54   : > { %v2238_v24 = vpop.permute.xlu1 %2237 }
 0xf55   : > { %v2240_v25 = vadd.f32 %v2238_v24, %v2234_v23 }
 0xf57   : > { %3129 = vtanh.f32 %v2240_v25 }
 0xf64   : > { %v3130_v31 = vpop.eup %3129 }
 0xf65   : > { %2246 = vrot.lane.b32.xlu1 %v3130_v31, %s3293_s23 }
 0xfd7   : > { %v2247_v33 = vpop.permute.xlu1 %2246 }
 0xfd8   : > { %v2249_v34 = vmul.f32 %v2247_v33, %v2243_v32  ;;  %v2627_v32 = vld [vmem:[%s4134_s12] sm:$0x1] }
 0xfda   : > { %2250 = vst.msk [vmem:[#allocation7] sm:$0x1] %vm1368_vm5, %v2249_v34 }
 0xfe1   : > { %v4013_v35 = vld [vmem:[#allocation7] sm:$0xf] }
 0xfe2   : > { %2927 = vmatmul.mubr.msk.f32.vlgmr.msra.gmra.mxu0 %vm1015_vm4, %v4013_v35 }
 0xfe3   : > { %2964 = vmatprep.mubr.msk.f32.mxu0 %vm3291_vm2, %v3290_v16  ;;  %2949 = vmatpush3.msra.mxu0 %v2480_v59 }
 0xfe4   : > { %2950 = vmatprep.subr.mxu0 %v3290_v16 }
 0xfe5   : > { %2951 = vmatpush3.msra.mxu0 %v2479_v63 }
 0xfe6   : > { %2952 = vmatprep.subr.mxu0 %v3290_v16 }
 0xfe7   : > { %2953 = vmatpush3.msra.mxu0 %v2478_v2 }
 0xfe8   : > { %2954 = vmatprep.subr.mxu0 %v3290_v16 }
 0xfe9   : > { %2955 = vmatpush3.msra.mxu0 %v2477_v4 }
 0xfea   : > { %2956 = vmatprep.subr.mxu0 %v3290_v16 }
 0xfeb   : > { %2957 = vmatpush3.msra.mxu0 %v2476_v6 }
 0xfec   : > { %2958 = vmatprep.subr.mxu0 %v3290_v16 }
 0xfed   : > { %2959 = vmatpush3.msra.mxu0 %v2475_v8 }
 0xfee   : > { %2960 = vmatprep.subr.mxu0 %v3290_v16 }
 0xfef   : > { %2961 = vmatpush3.msra.mxu0 %v2474_v11 }
 0xff0   : > { %2962 = vmatprep.subr.mxu0 %v3290_v16 }
 0xff1   : > { %2963 = vmatpush3.msra.mxu0 %v2473_v13 }
0x10a2   : > { %v2338_v37 = vpop.f32.mrf.mxu0 }
0x10a3   : > { %v2412_v39 = vadd.f32 %v2411_v19, %v2338_v37 }
0x10a4   : > { %v2928_v40 = vpop.f32.mrf.mxu0 }
0x10a5   : > { %v2422_v42 = vadd.f32 %v2778_v38, %v2412_v39 }
0x10a7   : > { %v2424_v43 = vsel %vm2423_vm6, %v2422_v42, -inf }
0x10a8   : > { %v2425_v44 = vrot.slane %v2424_v43, 4 }
0x10aa   : > { %v2426_v45 = vmax.f32 %v2424_v43, %v2425_v44 }
0x10ac   : > { %v2427_v46 = vrot.slane %v2426_v45, 2 }
0x10ae   : > { %v2428_v47 = vmax.f32 %v2426_v45, %v2427_v46 }
0x10b0   : > { %v2429_v48 = vrot.slane %v2428_v47, 1 }
0x10b2   : > { %v2430_v49 = vmax.f32 %v2428_v47, %v2429_v48 }
0x10b4   : > { %v2431_v50 = vsub.f32 %v2422_v42, %v2430_v49 }
0x10b6   : > { %v2432_v52 = vmul.f32 1.442695, %v2431_v50 }
0x10b8   : > { %3131 = vpow2.f32 %v2432_v52 }
0x10c5   : > { %v3132_v53 = vpop.eup %3131 }
0x10c6   : > { %v2434_v51 = vsel %vm2423_vm6, %v3132_v53, 0.0 }
0x10c7   : > { %v2435_v54 = vrot.slane %v2434_v51, 4 }
0x10c9   : > { %v2436_v55 = vadd.f32 %v2435_v54, %v2434_v51 }
0x10cb   : > { %v2437_v56 = vrot.slane %v2436_v55, 2 }
0x10cd   : > { %v2438_v57 = vadd.f32 %v2437_v56, %v2436_v55 }
0x10cf   : > { %v2439_v41 = vrot.slane %v2438_v57, 1 }
0x10d1   : > { %v2440_v58 = vadd.f32 %v2439_v41, %v2438_v57 }
0x10d3   : > { %3133 = vrcp.f32 %v2440_v58 }
0x10e0   : > { %v3134_v61 = vpop.eup %3133 }
0x10e1   : > { %v2442_v62 = vmul.f32 %v3134_v61, %v3132_v53 }
0x10e3   : > { %2445 = vperm.xlu0 %3066, %v2442_v62  }
0x115e   : > { %v2446_v15 = vpop.permute.xlu0 %2445 }
0x115f   : > { %v2448_v17 = vmul.f32 %v2446_v15, %v3968_v1  ;;  %v2457_v18 = vmul.f32 %v2446_v15, %v4013_v35 }
0x1161   : > { %v2450_v19 = vsel %vm2449_vm7, %v2448_v17, 0.0  ;;  %v2458_v20 = vsel %vm2449_vm7, %v2457_v18, 0.0 }
0x1162   : > { %v2451_v10 = vrot.slane %v2450_v19, 4  ;;  %v2459_v21 = vrot.slane %v2458_v20, 4 }
0x1164   : > { %v2452_v22 = vadd.f32 %v2451_v10, %v2450_v19  ;;  %v2460_v23 = vadd.f32 %v2459_v21, %v2458_v20 }
0x1166   : > { %v2453_v24 = vrot.slane %v2452_v22, 2  ;;  %v2461_v25 = vrot.slane %v2460_v23, 2 }
0x1168   : > { %v2454_v26 = vadd.f32 %v2453_v24, %v2452_v22  ;;  %v2462_v16 = vadd.f32 %v2461_v25, %v2460_v23 }
0x116a   : > { %v2455_v27 = vrot.slane %v2454_v26, 1  ;;  %v2463_v28 = vrot.slane %v2462_v16, 1 }
0x116c   : > { %v2456_v29 = vadd.f32 %v2455_v27, %v2454_v26  ;;  %v2464_v30 = vadd.f32 %v2463_v28, %v2462_v16 }
0x116e   : > { %2965 = vmatmul.mubr.msk.f32.vlgmr.msra.gmra.mxu0 %vm1015_vm4, %v2464_v30  ;;  %2984 = vmatmul.mubr.msk.f32.vlgmr.msra.gmra.mxu1 %vm1015_vm4, %v2456_v29 }
0x122e   : > { %v2550_v1 = vpop.f32.mrf.mxu0  ;;  %v2623_v31 = vpop.f32.mrf.mxu1 }
0x122f   : > { %v2624_v33 = vadd.f32 %v2623_v31, %v2550_v1 }
0x1230   : > { %v2966_v34 = vpop.f32.mrf.mxu0  ;;  %v2985_v35 = vpop.f32.mrf.mxu1 }
0x1231   : > { %v2628_v36 = vadd.f32 %v2627_v32, %v2624_v33 }
0x1233   : > { %2630 = vst.msk [vmem:[%s478_s20] sm:$0x1] %vm2629_vm8, %v2628_v36 }
0x1234   : > { %3226 = shalt.err (!%p3223_p0)
}
0x1235   : > { %s3227_s29 = scalar_lea.hbm %s2642_s26, 16  ;;  %s3231_s18 = scalar_lea.hbm %s4135_s13, 32 }
0x1236   : > { %p3228_p1 = scmp.ne.s32.totalorder %s2642_s26, %s3227_s29  ;;  %p3232_p4 = scmp.lt.s32.totalorder %s2642_s26, %s4135_s13 }
0x1237   : > { %p3233_p13 = scmp.lt.s32.totalorder %s3231_s18, %s3227_s29 }
0x1238   : > { %p3229_p2 = pnand %p3228_p1, %p3407_p5 }
0x1239   : > { %p3234_p9 = por %p3233_p13, %p3232_p4 }
0x123a   : > { %p3230_p3 = pneg %p3229_p2 }
0x123c   : > { %p3235_p10 = pnand %p3234_p9, %p3230_p3 }
0x123e   : > { %3238 = shalt.err (!%p3235_p10)
}
0x123f   : > { %2999 = dma.vmem_to_hbm [thread:$0]  (%p3407_p5), %s2645_s21, 16, %s2642_s26, %s2632_s16  }
0x1240 PF: > { %p3021_p12 = scmp.ge.s32.totalorder %s3281_s30, 2  ;;  %s2656_s17 = sand.u32 1, %s3269_s27  }
0x1241   : > { %s2657_s10 = scalar_lea.sflag [#allocation11], %s2656_s17 }
0x1242   : > { %p3012_p7 = pnand %p3021_p12, %p3411_p6 }
0x1244   : > { %p3013_p8 = pneg %p3012_p7 }
0x1246   : > { %3264 = dma.done.wait (%p3013_p8), %s2657_s10, 16  }
0x1247   : > { %3266 = vsyncadd (%p3013_p8), %s2657_s10, 4294967280  ;;  %s4149_s30 = sld [smem:[#allocation20_spill]]  ;;  %s4152_s27 = smov %s3273_s28 }
0x1248   : > { %s4150_s14 = sld [smem:[#allocation19_spill]] }
0x1249   : > { %s4151_s29 = sld [smem:[#allocation21_spill]] }
0x124d   : > { %p27_p11 = scmp.ge.s32.totalorder %s4149_s30, 4  }
0x124e   : > { %s4153_s28 = smov %s4150_s14 }
0x124f   :  { %29 = sbr.rel (!%p27_p11) target bundleno = 8 (0x8), region = 133 }
0x1254   :  { %2661 = vsyncpa [#allocation10], 1 }
0x1255   :  { %2663 = vsyncpa [#allocation10 + $0x1], 1 }
0x1256   :  { %2664 = vsyncpa [#allocation13], 1 }
0x1257   :  { %2665 = vsyncpa [#allocation11], 1 }
0x1258   :  { %2667 = vsyncpa [#allocation11 + $0x1], 1 }

</bundles_post_ra>
